<compile_context>
chip_gen: v7x
topology: tpu7x:2x2x1
jax: 0.10.0
libtpu: 0.0.40
codegen_flags: <defaults>
</compile_context>

<pallas_src>
import jax
import jax.numpy as jnp
from jax import lax
from jax.experimental import pallas as pl
from jax.experimental.pallas import tpu as pltpu


def _round_up(x, m):
    return (x + m - 1) // m * m


# ----------------------------------------------------------------------------
# Kernel: one grid step = Tc timesteps of the GRU recurrence
# ----------------------------------------------------------------------------
def _gru_chunk_kernel(gx_ref, h0_ref, wh_ref, bh_ref, wrhc_ref, brhc_ref,
                      hseq_ref, h_carry):
    Hp = h_carry.shape[1]
    Tc = gx_ref.shape[0]          # static (block shape)

    # Initialize the recurrent carry once, at the first chunk.
    @pl.when(pl.program_id(0) == 0)
    def _():
        h_carry[...] = h0_ref[...]

    def step(s, h):
        # Pre-projected input gates for this timestep: [ r_x | u_x | c_x ].
        gx = gx_ref[s]                                           # f32 (Bp, 3Hp)

        # Recurrent r|u projection: one (Bp,Hp) x (Hp,2Hp) bf16 MXU matmul.
        gh = jnp.dot(h.astype(jnp.bfloat16), wh_ref[...],
                     preferred_element_type=jnp.float32) + bh_ref[...]

        r = jax.nn.sigmoid(gx[:, :Hp] + gh[:, :Hp])
        # forget_bias was folded into bh's u-columns at prepare time.
        u = jax.nn.sigmoid(gx[:, Hp:2 * Hp] + gh[:, Hp:])

        # c = tanh(c_x + fc_rh_c(r * h)) -- depends on r, must stay in-loop.
        rh = (r * h).astype(jnp.bfloat16)
        c = jnp.tanh(
            gx[:, 2 * Hp:]
            + jnp.dot(rh, wrhc_ref[...], preferred_element_type=jnp.float32)
            + brhc_ref[...]
        )

        h_new = c + u * (h - c)                    # == u*h + (1-u)*c
        hseq_ref[s] = h_new                        # lane-dense f32 store
        return h_new

    h_carry[...] = lax.fori_loop(0, Tc, step, h_carry[...], unroll=True)


# ----------------------------------------------------------------------------
# One-time parameter preparation (transpose / fuse / pad, hoisted out of loop)
# ----------------------------------------------------------------------------
def prepare_params(params, input_size, hidden_size, forget_bias=1.0):
    """Prepare PyTorch-convention weights (nn.Linear weight shape = (out, in)).

    params:
      w_x_ru: (2H, I)   w_x_c: (H, I)
      w_h_ru: (2H, H)   b_h_ru: (2H,)
      w_rh_c: (H, H)    b_rh_c: (H,)
    """
    I, H = input_size, hidden_size
    Hp = _round_up(max(H, 1), 128)

    # x-side fused projection weight for the *parallel* pre-pass (kept f32; it
    # runs once over all T*B rows outside the serial loop).
    # Columns: [ r (:H) | pad | u (Hp:Hp+H) | pad | c (2Hp:2Hp+H) | pad ].
    w_x = jnp.zeros((max(I, 1), 3 * Hp), jnp.float32)
    if I > 0:
        w_x = w_x.at[:, 0:H].set(params["w_x_ru"][:H, :].T)
        w_x = w_x.at[:, Hp:Hp + H].set(params["w_x_ru"][H:, :].T)
        w_x = w_x.at[:, 2 * Hp:2 * Hp + H].set(params["w_x_c"].T)

    # Recurrent r|u weight (Hp, 2Hp) and bias; forget_bias folded into the real
    # u columns only (padded lanes keep bias 0 -> padded h lanes stay exactly 0).
    w_h = jnp.zeros((Hp, 2 * Hp), jnp.float32)
    w_h = w_h.at[:H, 0:H].set(params["w_h_ru"][:H, :].T)
    w_h = w_h.at[:H, Hp:Hp + H].set(params["w_h_ru"][H:, :].T)
    b_h = jnp.zeros((1, 2 * Hp), jnp.float32)
    b_h = b_h.at[0, 0:H].set(params["b_h_ru"][:H])
    b_h = b_h.at[0, Hp:Hp + H].set(params["b_h_ru"][H:] + forget_bias)

    w_rhc = jnp.zeros((Hp, Hp), jnp.float32).at[:H, :H].set(params["w_rh_c"].T)
    b_rhc = jnp.zeros((1, Hp), jnp.float32).at[0, :H].set(params["b_rh_c"])

    return {
        "w_x": w_x,                               # f32, used in XLA pre-pass
        "w_h": w_h.astype(jnp.bfloat16),          # bf16 MXU operands in-kernel
        "b_h": b_h,                               # f32 biases
        "w_rhc": w_rhc.astype(jnp.bfloat16),
        "b_rhc": b_rhc,
        "I": I, "H": H, "Hp": Hp,
    }


# ----------------------------------------------------------------------------
# Wrappers
# ----------------------------------------------------------------------------
def lfads_gru_seq(x_seq, h0, prep, time_chunk=8):
    """Run T GRU steps; each step == LFADSGRUCell.forward applied to x_seq[t].

    x_seq: (T, B, I) f32 (I may be 0 for the no-input branch)
    h0:    (B, H)    f32
    returns h_seq: (T, B, H) f32
    """
    T, B, I = x_seq.shape
    H = h0.shape[1]
    Hp = prep["Hp"]
    Bp = _round_up(max(B, 16), 16)        # bf16 min tile rows = 16
    Tc = max(1, min(time_chunk, T))
    Tp = pl.cdiv(T, Tc) * Tc

    # ---- Parallel pre-pass (outside the serial loop): x projection ---------
    if I > 0:
        gx = jnp.einsum("tbi,ij->tbj", x_seq.astype(jnp.float32), prep["w_x"])
    else:
        # Module's "x is None / input_size == 0" branch: r_x = u_x = c_x = 0.
        gx = jnp.zeros((T, B, 3 * Hp), jnp.float32)
    gx_p = jnp.pad(gx, ((0, Tp - T), (0, Bp - B), (0, 0)))
    h0_p = jnp.pad(h0.astype(jnp.float32), ((0, Bp - B), (0, Hp - H)))

    grid_spec = pltpu.PrefetchScalarGridSpec(
        num_scalar_prefetch=0,
        grid=(Tp // Tc,),
        in_specs=[
            # Per-chunk pre-projected input gates.
            pl.BlockSpec((Tc, Bp, 3 * Hp), lambda t: (t, 0, 0)),
            # Initial hidden state (constant block index, fetched once).
            pl.BlockSpec((Bp, Hp), lambda t: (0, 0)),
            # Weights / biases: constant block index -> VMEM-resident across
            # the whole sequence.  (For H ~ 1024+ on v5e/v7x consider
            # pipeline_mode=pl.Buffered(1) or raising vmem_limit_bytes, since
            # inputs are double-buffered by default.)
            pl.BlockSpec((Hp, 2 * Hp), lambda t: (0, 0)),
            pl.BlockSpec((1, 2 * Hp), lambda t: (0, 0)),
            pl.BlockSpec((Hp, Hp), lambda t: (0, 0)),
            pl.BlockSpec((1, Hp), lambda t: (0, 0)),
        ],
        out_specs=pl.BlockSpec((Tc, Bp, Hp), lambda t: (t, 0, 0)),
        scratch_shapes=[pltpu.VMEM((Bp, Hp), jnp.float32)],   # f32 h carry
    )

    h_seq_p = pl.pallas_call(
        _gru_chunk_kernel,
        out_shape=jax.ShapeDtypeStruct((Tp, Bp, Hp), jnp.float32),
        grid_spec=grid_spec,
        compiler_params=pltpu.CompilerParams(
            dimension_semantics=("arbitrary",)),   # sequential recurrence
    )(gx_p, h0_p, prep["w_h"], prep["b_h"], prep["w_rhc"], prep["b_rhc"])

    return h_seq_p[:T, :B, :H]


def lfads_gru_cell(x, h, prep):
    """Single GRU step (T=1), identical semantics to LFADSGRUCell.forward."""
    return lfads_gru_seq(x[None], h, prep, time_chunk=1)[0]


# ----------------------------------------------------------------------------
# Pure-JAX references (f32, PyTorch-convention weights)
# ----------------------------------------------------------------------------
def lfads_gru_cell_ref(x, h, params, forget_bias=1.0):
    H = h.shape[1]
    x_ru = x @ params["w_x_ru"].T
    r_x, u_x = x_ru[:, :H], x_ru[:, H:]
    h_ru = h @ params["w_h_ru"].T + params["b_h_ru"]
    r_h, u_h = h_ru[:, :H], h_ru[:, H:]
    r = jax.nn.sigmoid(r_x + r_h)
    u = jax.nn.sigmoid(u_x + u_h + forget_bias)
    c_x = x @ params["w_x_c"].T
    c_rh = (r * h) @ params["w_rh_c"].T + params["b_rh_c"]
    c = jnp.tanh(c_x + c_rh)
    return u * h + (1.0 - u) * c


def lfads_gru_seq_ref(x_seq, h0, params, forget_bias=1.0):
    h = h0
    outs = []
    for t in range(x_seq.shape[0]):
        h = lfads_gru_cell_ref(x_seq[t], h, params, forget_bias)
        outs.append(h)
    return jnp.stack(outs, 0)


def init_params(key, input_size, hidden_size):
    """Deterministic synthetic init (uniform +/- 1/sqrt(fan_in), torch-like)."""
    ks = jax.random.split(key, 6)
    ru = 2 * hidden_size

    def unif(k, shape, fan_in):
        b = 1.0 / jnp.sqrt(fan_in)
        return jax.random.uniform(k, shape, jnp.float32, -b, b)

    return {
        "w_x_ru": unif(ks[0], (ru, input_size), input_size),
        "w_x_c": unif(ks[1], (hidden_size, input_size), input_size),
        "w_h_ru": unif(ks[2], (ru, hidden_size), hidden_size),
        "b_h_ru": unif(ks[3], (ru,), hidden_size),
        "w_rh_c": unif(ks[4], (hidden_size, hidden_size), hidden_size),
        "b_rh_c": unif(ks[5], (hidden_size,), hidden_size),
    }


if __name__ == "__main__":
    B, I, H, T = 8, 16, 32, 8
    key = jax.random.PRNGKey(0)
    kx, kh, kp = jax.random.split(key, 3)

    x_seq = jax.random.normal(kx, (T, B, I), jnp.float32)
    h0 = jax.random.normal(kh, (B, H), jnp.float32)
    params = init_params(kp, I, H)

    # One-time weight prep (transpose/split/fuse/pad + forget_bias fold).
    prep = prepare_params(params, I, H, forget_bias=1.0)

    # Fused sequence kernel; time_chunk=4 exercises the cross-chunk h carry.
    h_seq = jax.block_until_ready(lfads_gru_seq(x_seq, h0, prep, time_chunk=4))
    h_ref = lfads_gru_seq_ref(x_seq, h0, params, forget_bias=1.0)
    assert h_seq.shape == (T, B, H)
    # bf16 recurrent matmul operands (f32 accumulation) -> relaxed tolerance.
    assert jnp.allclose(h_seq, h_ref, atol=3e-2, rtol=3e-2), (
        "sequence mismatch, max abs err %e"
        % float(jnp.max(jnp.abs(h_seq - h_ref))))

    # Single-step path matches the module forward directly.
    h1 = jax.block_until_ready(lfads_gru_cell(x_seq[0], h0, prep))
    h1_ref = lfads_gru_cell_ref(x_seq[0], h0, params, forget_bias=1.0)
    assert jnp.allclose(h1, h1_ref, atol=1e-2, rtol=1e-2), (
        "single-step mismatch, max abs err %e"
        % float(jnp.max(jnp.abs(h1 - h1_ref))))

    # TODO(synk): passing x=None directly is not supported; use a zero-width
    # x_seq (I == 0) to get the module's no-input branch.
    print("KERNEL_OK")
</pallas_src>

<mosaic_0001>
module attributes {stable_mosaic.version = 11 : i64} {
  func.func @_gru_chunk_kernel(%arg0: i32, %arg1: memref<4x16x384xf32, #tpu.memory_space<vmem>>, %arg2: memref<16x128xf32, #tpu.memory_space<vmem>>, %arg3: memref<128x256xbf16, #tpu.memory_space<vmem>>, %arg4: memref<1x256xf32, #tpu.memory_space<vmem>>, %arg5: memref<128x128xbf16, #tpu.memory_space<vmem>>, %arg6: memref<1x128xf32, #tpu.memory_space<vmem>>, %arg7: memref<4x16x128xf32, #tpu.memory_space<vmem>>, %arg8: memref<16x128xf32, #tpu.memory_space<vmem>>) attributes {dimension_semantics = [#tpu.dimension_semantics<arbitrary>], iteration_bounds = array<i64: 2>, scalar_prefetch = 0 : i64, scratch_operands = 1 : i64, tpu.core_type = #tpu.core_type<tc>, window_params = [{transform_indices = @transform_0, window_bounds = array<i64: 4, 16, 384>}, {pipeline_mode = #tpu.pipeline_mode<synchronous>, transform_indices = @transform_1, window_bounds = array<i64: 16, 128>}, {pipeline_mode = #tpu.pipeline_mode<synchronous>, transform_indices = @transform_2, window_bounds = array<i64: 128, 256>}, {pipeline_mode = #tpu.pipeline_mode<synchronous>, transform_indices = @transform_3, window_bounds = array<i64: 1, 256>}, {pipeline_mode = #tpu.pipeline_mode<synchronous>, transform_indices = @transform_4, window_bounds = array<i64: 128, 128>}, {pipeline_mode = #tpu.pipeline_mode<synchronous>, transform_indices = @transform_5, window_bounds = array<i64: 1, 128>}, {transform_indices = @transform_6, window_bounds = array<i64: 4, 16, 128>}]} {
    %c0_i32 = arith.constant 0 : i32
    %0 = arith.cmpi eq, %arg0, %c0_i32 : i32
    %1 = arith.extui %0 : i1 to i32
    %c0_i32_0 = arith.constant 0 : i32
    %2 = arith.cmpi ne, %1, %c0_i32_0 : i32
    scf.if %2 {
      %c0_68 = arith.constant 0 : index
      %c0_69 = arith.constant 0 : index
      %173 = vector.load %arg2[%c0_68, %c0_69] : memref<16x128xf32, #tpu.memory_space<vmem>>, vector<16x128xf32>
      %c0_70 = arith.constant 0 : index
      %c0_71 = arith.constant 0 : index
      %174 = vector.load %arg8[%c0_70, %c0_71] : memref<16x128xf32, #tpu.memory_space<vmem>>, vector<16x128xf32>
      tpu.vector_store %arg8[%c0_70, %c0_71], %173 {strides = array<i32>} : memref<16x128xf32, #tpu.memory_space<vmem>>, vector<16x128xf32>,
    } else {
    }
    %c0 = arith.constant 0 : index
    %c0_1 = arith.constant 0 : index
    %3 = vector.load %arg8[%c0, %c0_1] : memref<16x128xf32, #tpu.memory_space<vmem>>, vector<16x128xf32>
    %c0_i32_2 = arith.constant 0 : i32
    %4 = arith.index_cast %c0_i32_2 : i32 to index
    %c0_3 = arith.constant 0 : index
    %c0_4 = arith.constant 0 : index
    %5 = vector.load %arg1[%4, %c0_3, %c0_4] : memref<4x16x384xf32, #tpu.memory_space<vmem>>, vector<1x16x384xf32>
    %6 = vector.shape_cast %5 : vector<1x16x384xf32> to vector<16x384xf32>
    %7 = arith.truncf %3 : vector<16x128xf32> to vector<16x128xbf16>
    %c0_5 = arith.constant 0 : index
    %c0_6 = arith.constant 0 : index
    %8 = vector.load %arg3[%c0_5, %c0_6] : memref<128x256xbf16, #tpu.memory_space<vmem>>, vector<128x256xbf16>
    %cst = arith.constant dense<0.000000e+00> : vector<16x256xf32>
    %9 = tpu.matmul %7, %8, %cst {dimension_numbers = #tpu.dot_dimension_numbers<[1], [0], [0], [1], [0, 0, 1, 1], [], []>} : vector<16x128xbf16>, vector<128x256xbf16>, vector<16x256xf32> -> vector<16x256xf32>
    %c0_7 = arith.constant 0 : index
    %c0_8 = arith.constant 0 : index
    %10 = vector.load %arg4[%c0_7, %c0_8] : memref<1x256xf32, #tpu.memory_space<vmem>>, vector<1x256xf32>
    %11 = vector.broadcast %10 : vector<1x256xf32> to vector<16x256xf32>
    %12 = arith.addf %9, %11 : vector<16x256xf32>
    %13 = vector.extract_strided_slice %6 {offsets = [0, 0], sizes = [16, 128], strides = [1, 1]} : vector<16x384xf32> to vector<16x128xf32>
    %14 = vector.extract_strided_slice %12 {offsets = [0, 0], sizes = [16, 128], strides = [1, 1]} : vector<16x256xf32> to vector<16x128xf32>
    %15 = arith.addf %13, %14 : vector<16x128xf32>
    %16 = arith.negf %15 : vector<16x128xf32>
    %17 = math.exp %16 : vector<16x128xf32>
    %cst_9 = arith.constant 1.000000e+00 : f32
    %18 = vector.broadcast %cst_9 : f32 to vector<16x128xf32>
    %19 = arith.addf %18, %17 : vector<16x128xf32>
    %20 = arith.divf %18, %19 : vector<16x128xf32>
    %21 = vector.extract_strided_slice %6 {offsets = [0, 128], sizes = [16, 128], strides = [1, 1]} : vector<16x384xf32> to vector<16x128xf32>
    %22 = vector.extract_strided_slice %12 {offsets = [0, 128], sizes = [16, 128], strides = [1, 1]} : vector<16x256xf32> to vector<16x128xf32>
    %23 = arith.addf %21, %22 : vector<16x128xf32>
    %24 = arith.negf %23 : vector<16x128xf32>
    %25 = math.exp %24 : vector<16x128xf32>
    %cst_10 = arith.constant 1.000000e+00 : f32
    %26 = vector.broadcast %cst_10 : f32 to vector<16x128xf32>
    %27 = arith.addf %26, %25 : vector<16x128xf32>
    %28 = arith.divf %26, %27 : vector<16x128xf32>
    %29 = arith.mulf %20, %3 : vector<16x128xf32>
    %30 = arith.truncf %29 : vector<16x128xf32> to vector<16x128xbf16>
    %31 = vector.extract_strided_slice %6 {offsets = [0, 256], sizes = [16, 128], strides = [1, 1]} : vector<16x384xf32> to vector<16x128xf32>
    %c0_11 = arith.constant 0 : index
    %c0_12 = arith.constant 0 : index
    %32 = vector.load %arg5[%c0_11, %c0_12] : memref<128x128xbf16, #tpu.memory_space<vmem>>, vector<128x128xbf16>
    %cst_13 = arith.constant dense<0.000000e+00> : vector<16x128xf32>
    %33 = tpu.matmul %30, %32, %cst_13 {dimension_numbers = #tpu.dot_dimension_numbers<[1], [0], [0], [1], [0, 0, 1, 1], [], []>} : vector<16x128xbf16>, vector<128x128xbf16>, vector<16x128xf32> -> vector<16x128xf32>
    %34 = arith.addf %31, %33 : vector<16x128xf32>
    %c0_14 = arith.constant 0 : index
    %c0_15 = arith.constant 0 : index
    %35 = vector.load %arg6[%c0_14, %c0_15] : memref<1x128xf32, #tpu.memory_space<vmem>>, vector<1x128xf32>
    %36 = vector.broadcast %35 : vector<1x128xf32> to vector<16x128xf32>
    %37 = arith.addf %34, %36 : vector<16x128xf32>
    %38 = math.tanh %37 : vector<16x128xf32>
    %39 = arith.subf %3, %38 : vector<16x128xf32>
    %40 = arith.mulf %28, %39 : vector<16x128xf32>
    %41 = arith.addf %38, %40 : vector<16x128xf32>
    %42 = arith.index_cast %c0_i32_2 : i32 to index
    %c0_16 = arith.constant 0 : index
    %c0_17 = arith.constant 0 : index
    %43 = vector.load %arg7[%42, %c0_16, %c0_17] : memref<4x16x128xf32, #tpu.memory_space<vmem>>, vector<1x16x128xf32>
    %44 = vector.shape_cast %43 : vector<1x16x128xf32> to vector<16x128xf32>
    %45 = vector.shape_cast %41 : vector<16x128xf32> to vector<1x16x128xf32>
    tpu.vector_store %arg7[%42, %c0_16, %c0_17], %45 {strides = array<i32>} : memref<4x16x128xf32, #tpu.memory_space<vmem>>, vector<1x16x128xf32>,
    %c1_i32 = arith.constant 1 : i32
    %46 = arith.index_cast %c1_i32 : i32 to index
    %c0_18 = arith.constant 0 : index
    %c0_19 = arith.constant 0 : index
    %47 = vector.load %arg1[%46, %c0_18, %c0_19] : memref<4x16x384xf32, #tpu.memory_space<vmem>>, vector<1x16x384xf32>
    %48 = vector.shape_cast %47 : vector<1x16x384xf32> to vector<16x384xf32>
    %49 = arith.truncf %41 : vector<16x128xf32> to vector<16x128xbf16>
    %c0_20 = arith.constant 0 : index
    %c0_21 = arith.constant 0 : index
    %50 = vector.load %arg3[%c0_20, %c0_21] : memref<128x256xbf16, #tpu.memory_space<vmem>>, vector<128x256xbf16>
    %cst_22 = arith.constant dense<0.000000e+00> : vector<16x256xf32>
    %51 = tpu.matmul %49, %50, %cst_22 {dimension_numbers = #tpu.dot_dimension_numbers<[1], [0], [0], [1], [0, 0, 1, 1], [], []>} : vector<16x128xbf16>, vector<128x256xbf16>, vector<16x256xf32> -> vector<16x256xf32>
    %c0_23 = arith.constant 0 : index
    %c0_24 = arith.constant 0 : index
    %52 = vector.load %arg4[%c0_23, %c0_24] : memref<1x256xf32, #tpu.memory_space<vmem>>, vector<1x256xf32>
    %53 = vector.broadcast %52 : vector<1x256xf32> to vector<16x256xf32>
    %54 = arith.addf %51, %53 : vector<16x256xf32>
    %55 = vector.extract_strided_slice %48 {offsets = [0, 0], sizes = [16, 128], strides = [1, 1]} : vector<16x384xf32> to vector<16x128xf32>
    %56 = vector.extract_strided_slice %54 {offsets = [0, 0], sizes = [16, 128], strides = [1, 1]} : vector<16x256xf32> to vector<16x128xf32>
    %57 = arith.addf %55, %56 : vector<16x128xf32>
    %58 = arith.negf %57 : vector<16x128xf32>
    %59 = math.exp %58 : vector<16x128xf32>
    %cst_25 = arith.constant 1.000000e+00 : f32
    %60 = vector.broadcast %cst_25 : f32 to vector<16x128xf32>
    %61 = arith.addf %60, %59 : vector<16x128xf32>
    %62 = arith.divf %60, %61 : vector<16x128xf32>
    %63 = vector.extract_strided_slice %48 {offsets = [0, 128], sizes = [16, 128], strides = [1, 1]} : vector<16x384xf32> to vector<16x128xf32>
    %64 = vector.extract_strided_slice %54 {offsets = [0, 128], sizes = [16, 128], strides = [1, 1]} : vector<16x256xf32> to vector<16x128xf32>
    %65 = arith.addf %63, %64 : vector<16x128xf32>
    %66 = arith.negf %65 : vector<16x128xf32>
    %67 = math.exp %66 : vector<16x128xf32>
    %cst_26 = arith.constant 1.000000e+00 : f32
    %68 = vector.broadcast %cst_26 : f32 to vector<16x128xf32>
    %69 = arith.addf %68, %67 : vector<16x128xf32>
    %70 = arith.divf %68, %69 : vector<16x128xf32>
    %71 = arith.mulf %62, %41 : vector<16x128xf32>
    %72 = arith.truncf %71 : vector<16x128xf32> to vector<16x128xbf16>
    %73 = vector.extract_strided_slice %48 {offsets = [0, 256], sizes = [16, 128], strides = [1, 1]} : vector<16x384xf32> to vector<16x128xf32>
    %c0_27 = arith.constant 0 : index
    %c0_28 = arith.constant 0 : index
    %74 = vector.load %arg5[%c0_27, %c0_28] : memref<128x128xbf16, #tpu.memory_space<vmem>>, vector<128x128xbf16>
    %cst_29 = arith.constant dense<0.000000e+00> : vector<16x128xf32>
    %75 = tpu.matmul %72, %74, %cst_29 {dimension_numbers = #tpu.dot_dimension_numbers<[1], [0], [0], [1], [0, 0, 1, 1], [], []>} : vector<16x128xbf16>, vector<128x128xbf16>, vector<16x128xf32> -> vector<16x128xf32>
    %76 = arith.addf %73, %75 : vector<16x128xf32>
    %c0_30 = arith.constant 0 : index
    %c0_31 = arith.constant 0 : index
    %77 = vector.load %arg6[%c0_30, %c0_31] : memref<1x128xf32, #tpu.memory_space<vmem>>, vector<1x128xf32>
    %78 = vector.broadcast %77 : vector<1x128xf32> to vector<16x128xf32>
    %79 = arith.addf %76, %78 : vector<16x128xf32>
    %80 = math.tanh %79 : vector<16x128xf32>
    %81 = arith.subf %41, %80 : vector<16x128xf32>
    %82 = arith.mulf %70, %81 : vector<16x128xf32>
    %83 = arith.addf %80, %82 : vector<16x128xf32>
    %84 = arith.index_cast %c1_i32 : i32 to index
    %c0_32 = arith.constant 0 : index
    %c0_33 = arith.constant 0 : index
    %85 = vector.load %arg7[%84, %c0_32, %c0_33] : memref<4x16x128xf32, #tpu.memory_space<vmem>>, vector<1x16x128xf32>
    %86 = vector.shape_cast %85 : vector<1x16x128xf32> to vector<16x128xf32>
    %87 = vector.shape_cast %83 : vector<16x128xf32> to vector<1x16x128xf32>
    tpu.vector_store %arg7[%84, %c0_32, %c0_33], %87 {strides = array<i32>} : memref<4x16x128xf32, #tpu.memory_space<vmem>>, vector<1x16x128xf32>,
    %c2_i32 = arith.constant 2 : i32
    %88 = arith.index_cast %c2_i32 : i32 to index
    %c0_34 = arith.constant 0 : index
    %c0_35 = arith.constant 0 : index
    %89 = vector.load %arg1[%88, %c0_34, %c0_35] : memref<4x16x384xf32, #tpu.memory_space<vmem>>, vector<1x16x384xf32>
    %90 = vector.shape_cast %89 : vector<1x16x384xf32> to vector<16x384xf32>
    %91 = arith.truncf %83 : vector<16x128xf32> to vector<16x128xbf16>
    %c0_36 = arith.constant 0 : index
    %c0_37 = arith.constant 0 : index
    %92 = vector.load %arg3[%c0_36, %c0_37] : memref<128x256xbf16, #tpu.memory_space<vmem>>, vector<128x256xbf16>
    %cst_38 = arith.constant dense<0.000000e+00> : vector<16x256xf32>
    %93 = tpu.matmul %91, %92, %cst_38 {dimension_numbers = #tpu.dot_dimension_numbers<[1], [0], [0], [1], [0, 0, 1, 1], [], []>} : vector<16x128xbf16>, vector<128x256xbf16>, vector<16x256xf32> -> vector<16x256xf32>
    %c0_39 = arith.constant 0 : index
    %c0_40 = arith.constant 0 : index
    %94 = vector.load %arg4[%c0_39, %c0_40] : memref<1x256xf32, #tpu.memory_space<vmem>>, vector<1x256xf32>
    %95 = vector.broadcast %94 : vector<1x256xf32> to vector<16x256xf32>
    %96 = arith.addf %93, %95 : vector<16x256xf32>
    %97 = vector.extract_strided_slice %90 {offsets = [0, 0], sizes = [16, 128], strides = [1, 1]} : vector<16x384xf32> to vector<16x128xf32>
    %98 = vector.extract_strided_slice %96 {offsets = [0, 0], sizes = [16, 128], strides = [1, 1]} : vector<16x256xf32> to vector<16x128xf32>
    %99 = arith.addf %97, %98 : vector<16x128xf32>
    %100 = arith.negf %99 : vector<16x128xf32>
    %101 = math.exp %100 : vector<16x128xf32>
    %cst_41 = arith.constant 1.000000e+00 : f32
    %102 = vector.broadcast %cst_41 : f32 to vector<16x128xf32>
    %103 = arith.addf %102, %101 : vector<16x128xf32>
    %104 = arith.divf %102, %103 : vector<16x128xf32>
    %105 = vector.extract_strided_slice %90 {offsets = [0, 128], sizes = [16, 128], strides = [1, 1]} : vector<16x384xf32> to vector<16x128xf32>
    %106 = vector.extract_strided_slice %96 {offsets = [0, 128], sizes = [16, 128], strides = [1, 1]} : vector<16x256xf32> to vector<16x128xf32>
    %107 = arith.addf %105, %106 : vector<16x128xf32>
    %108 = arith.negf %107 : vector<16x128xf32>
    %109 = math.exp %108 : vector<16x128xf32>
    %cst_42 = arith.constant 1.000000e+00 : f32
    %110 = vector.broadcast %cst_42 : f32 to vector<16x128xf32>
    %111 = arith.addf %110, %109 : vector<16x128xf32>
    %112 = arith.divf %110, %111 : vector<16x128xf32>
    %113 = arith.mulf %104, %83 : vector<16x128xf32>
    %114 = arith.truncf %113 : vector<16x128xf32> to vector<16x128xbf16>
    %115 = vector.extract_strided_slice %90 {offsets = [0, 256], sizes = [16, 128], strides = [1, 1]} : vector<16x384xf32> to vector<16x128xf32>
    %c0_43 = arith.constant 0 : index
    %c0_44 = arith.constant 0 : index
    %116 = vector.load %arg5[%c0_43, %c0_44] : memref<128x128xbf16, #tpu.memory_space<vmem>>, vector<128x128xbf16>
    %cst_45 = arith.constant dense<0.000000e+00> : vector<16x128xf32>
    %117 = tpu.matmul %114, %116, %cst_45 {dimension_numbers = #tpu.dot_dimension_numbers<[1], [0], [0], [1], [0, 0, 1, 1], [], []>} : vector<16x128xbf16>, vector<128x128xbf16>, vector<16x128xf32> -> vector<16x128xf32>
    %118 = arith.addf %115, %117 : vector<16x128xf32>
    %c0_46 = arith.constant 0 : index
    %c0_47 = arith.constant 0 : index
    %119 = vector.load %arg6[%c0_46, %c0_47] : memref<1x128xf32, #tpu.memory_space<vmem>>, vector<1x128xf32>
    %120 = vector.broadcast %119 : vector<1x128xf32> to vector<16x128xf32>
    %121 = arith.addf %118, %120 : vector<16x128xf32>
    %122 = math.tanh %121 : vector<16x128xf32>
    %123 = arith.subf %83, %122 : vector<16x128xf32>
    %124 = arith.mulf %112, %123 : vector<16x128xf32>
    %125 = arith.addf %122, %124 : vector<16x128xf32>
    %126 = arith.index_cast %c2_i32 : i32 to index
    %c0_48 = arith.constant 0 : index
    %c0_49 = arith.constant 0 : index
    %127 = vector.load %arg7[%126, %c0_48, %c0_49] : memref<4x16x128xf32, #tpu.memory_space<vmem>>, vector<1x16x128xf32>
    %128 = vector.shape_cast %127 : vector<1x16x128xf32> to vector<16x128xf32>
    %129 = vector.shape_cast %125 : vector<16x128xf32> to vector<1x16x128xf32>
    tpu.vector_store %arg7[%126, %c0_48, %c0_49], %129 {strides = array<i32>} : memref<4x16x128xf32, #tpu.memory_space<vmem>>, vector<1x16x128xf32>,
    %c3_i32 = arith.constant 3 : i32
    %130 = arith.index_cast %c3_i32 : i32 to index
    %c0_50 = arith.constant 0 : index
    %c0_51 = arith.constant 0 : index
    %131 = vector.load %arg1[%130, %c0_50, %c0_51] : memref<4x16x384xf32, #tpu.memory_space<vmem>>, vector<1x16x384xf32>
    %132 = vector.shape_cast %131 : vector<1x16x384xf32> to vector<16x384xf32>
    %133 = arith.truncf %125 : vector<16x128xf32> to vector<16x128xbf16>
    %c0_52 = arith.constant 0 : index
    %c0_53 = arith.constant 0 : index
    %134 = vector.load %arg3[%c0_52, %c0_53] : memref<128x256xbf16, #tpu.memory_space<vmem>>, vector<128x256xbf16>
    %cst_54 = arith.constant dense<0.000000e+00> : vector<16x256xf32>
    %135 = tpu.matmul %133, %134, %cst_54 {dimension_numbers = #tpu.dot_dimension_numbers<[1], [0], [0], [1], [0, 0, 1, 1], [], []>} : vector<16x128xbf16>, vector<128x256xbf16>, vector<16x256xf32> -> vector<16x256xf32>
    %c0_55 = arith.constant 0 : index
    %c0_56 = arith.constant 0 : index
    %136 = vector.load %arg4[%c0_55, %c0_56] : memref<1x256xf32, #tpu.memory_space<vmem>>, vector<1x256xf32>
    %137 = vector.broadcast %136 : vector<1x256xf32> to vector<16x256xf32>
    %138 = arith.addf %135, %137 : vector<16x256xf32>
    %139 = vector.extract_strided_slice %132 {offsets = [0, 0], sizes = [16, 128], strides = [1, 1]} : vector<16x384xf32> to vector<16x128xf32>
    %140 = vector.extract_strided_slice %138 {offsets = [0, 0], sizes = [16, 128], strides = [1, 1]} : vector<16x256xf32> to vector<16x128xf32>
    %141 = arith.addf %139, %140 : vector<16x128xf32>
    %142 = arith.negf %141 : vector<16x128xf32>
    %143 = math.exp %142 : vector<16x128xf32>
    %cst_57 = arith.constant 1.000000e+00 : f32
    %144 = vector.broadcast %cst_57 : f32 to vector<16x128xf32>
    %145 = arith.addf %144, %143 : vector<16x128xf32>
    %146 = arith.divf %144, %145 : vector<16x128xf32>
    %147 = vector.extract_strided_slice %132 {offsets = [0, 128], sizes = [16, 128], strides = [1, 1]} : vector<16x384xf32> to vector<16x128xf32>
    %148 = vector.extract_strided_slice %138 {offsets = [0, 128], sizes = [16, 128], strides = [1, 1]} : vector<16x256xf32> to vector<16x128xf32>
    %149 = arith.addf %147, %148 : vector<16x128xf32>
    %150 = arith.negf %149 : vector<16x128xf32>
    %151 = math.exp %150 : vector<16x128xf32>
    %cst_58 = arith.constant 1.000000e+00 : f32
    %152 = vector.broadcast %cst_58 : f32 to vector<16x128xf32>
    %153 = arith.addf %152, %151 : vector<16x128xf32>
    %154 = arith.divf %152, %153 : vector<16x128xf32>
    %155 = arith.mulf %146, %125 : vector<16x128xf32>
    %156 = arith.truncf %155 : vector<16x128xf32> to vector<16x128xbf16>
    %157 = vector.extract_strided_slice %132 {offsets = [0, 256], sizes = [16, 128], strides = [1, 1]} : vector<16x384xf32> to vector<16x128xf32>
    %c0_59 = arith.constant 0 : index
    %c0_60 = arith.constant 0 : index
    %158 = vector.load %arg5[%c0_59, %c0_60] : memref<128x128xbf16, #tpu.memory_space<vmem>>, vector<128x128xbf16>
    %cst_61 = arith.constant dense<0.000000e+00> : vector<16x128xf32>
    %159 = tpu.matmul %156, %158, %cst_61 {dimension_numbers = #tpu.dot_dimension_numbers<[1], [0], [0], [1], [0, 0, 1, 1], [], []>} : vector<16x128xbf16>, vector<128x128xbf16>, vector<16x128xf32> -> vector<16x128xf32>
    %160 = arith.addf %157, %159 : vector<16x128xf32>
    %c0_62 = arith.constant 0 : index
    %c0_63 = arith.constant 0 : index
    %161 = vector.load %arg6[%c0_62, %c0_63] : memref<1x128xf32, #tpu.memory_space<vmem>>, vector<1x128xf32>
    %162 = vector.broadcast %161 : vector<1x128xf32> to vector<16x128xf32>
    %163 = arith.addf %160, %162 : vector<16x128xf32>
    %164 = math.tanh %163 : vector<16x128xf32>
    %165 = arith.subf %125, %164 : vector<16x128xf32>
    %166 = arith.mulf %154, %165 : vector<16x128xf32>
    %167 = arith.addf %164, %166 : vector<16x128xf32>
    %168 = arith.index_cast %c3_i32 : i32 to index
    %c0_64 = arith.constant 0 : index
    %c0_65 = arith.constant 0 : index
    %169 = vector.load %arg7[%168, %c0_64, %c0_65] : memref<4x16x128xf32, #tpu.memory_space<vmem>>, vector<1x16x128xf32>
    %170 = vector.shape_cast %169 : vector<1x16x128xf32> to vector<16x128xf32>
    %171 = vector.shape_cast %167 : vector<16x128xf32> to vector<1x16x128xf32>
    tpu.vector_store %arg7[%168, %c0_64, %c0_65], %171 {strides = array<i32>} : memref<4x16x128xf32, #tpu.memory_space<vmem>>, vector<1x16x128xf32>,
    %c4_i32 = arith.constant 4 : i32
    %c0_66 = arith.constant 0 : index
    %c0_67 = arith.constant 0 : index
    %172 = vector.load %arg8[%c0_66, %c0_67] : memref<16x128xf32, #tpu.memory_space<vmem>>, vector<16x128xf32>
    tpu.vector_store %arg8[%c0_66, %c0_67], %167 {strides = array<i32>} : memref<16x128xf32, #tpu.memory_space<vmem>>, vector<16x128xf32>,
    return
  }
  func.func @transform_0(%arg0: i32) -> (i32, i32, i32) {
    %c0_i32 = arith.constant 0 : i32
    %c0_i32_0 = arith.constant 0 : i32
    %c0_i32_1 = arith.constant 0 : i32
    return %arg0, %c0_i32, %c0_i32_0 : i32, i32, i32
  }
  func.func @transform_1(%arg0: i32) -> (i32, i32) {
    %c0_i32 = arith.constant 0 : i32
    %c0_i32_0 = arith.constant 0 : i32
    %c0_i32_1 = arith.constant 0 : i32
    return %c0_i32, %c0_i32_0 : i32, i32
  }
  func.func @transform_2(%arg0: i32) -> (i32, i32) {
    %c0_i32 = arith.constant 0 : i32
    %c0_i32_0 = arith.constant 0 : i32
    %c0_i32_1 = arith.constant 0 : i32
    return %c0_i32, %c0_i32_0 : i32, i32
  }
  func.func @transform_3(%arg0: i32) -> (i32, i32) {
    %c0_i32 = arith.constant 0 : i32
    %c0_i32_0 = arith.constant 0 : i32
    %c0_i32_1 = arith.constant 0 : i32
    return %c0_i32, %c0_i32_0 : i32, i32
  }
  func.func @transform_4(%arg0: i32) -> (i32, i32) {
    %c0_i32 = arith.constant 0 : i32
    %c0_i32_0 = arith.constant 0 : i32
    %c0_i32_1 = arith.constant 0 : i32
    return %c0_i32, %c0_i32_0 : i32, i32
  }
  func.func @transform_5(%arg0: i32) -> (i32, i32) {
    %c0_i32 = arith.constant 0 : i32
    %c0_i32_0 = arith.constant 0 : i32
    %c0_i32_1 = arith.constant 0 : i32
    return %c0_i32, %c0_i32_0 : i32, i32
  }
  func.func @transform_6(%arg0: i32) -> (i32, i32, i32) {
    %c0_i32 = arith.constant 0 : i32
    %c0_i32_0 = arith.constant 0 : i32
    %c0_i32_1 = arith.constant 0 : i32
    return %arg0, %c0_i32, %c0_i32_0 : i32, i32, i32
  }
}

</mosaic_0001>

<bundles_post_ra>
// kernel: tpu_custom_call.1
= control target key start
LH: loop header
LB: loop body
LE: loop exit
PB: predicated region body
PF: predicated region fallthrough
CT: control target
= control target key end

     0   :  { %11 = vsyncpa [#allocation4], 0  ;;  %s2983_s0 = inlined_call_operand.hbm [shape: f32[8,16,384], index: 0, kind: input, shape index: {}]   ;;  %s2984_s1 = inlined_call_operand.hbm [shape: f32[16,128], index: 1, kind: input, shape index: {}]   ;;  %s2985_s2 = inlined_call_operand.hbm [shape: bf16[128,256], index: 2, kind: input, shape index: {}]   ;;  %s2986_s3 = inlined_call_operand.vmem [shape: f32[1,256], index: 3, kind: input, shape index: {}]   ;;  %s2987_s4 = inlined_call_operand.hbm [shape: bf16[128,128], index: 4, kind: input, shape index: {}]   ;;  %s2988_s5 = inlined_call_operand.vmem [shape: f32[1,128], index: 5, kind: input, shape index: {}]   ;;  %s2989_s6 = inlined_call_operand.hbm [shape: f32[8,16,128], index: 6, kind: output, shape index: {}]  }
   0x1   :  { %13 = vsyncpa [#allocation4 + $0x1], 0 }
   0x2   :  { %14 = vsyncpa [#allocation7], 0 }
   0x3   :  { %15 = vsyncpa [#allocation10], 0 }
   0x4   :  { %16 = vsyncpa [#allocation5], 0 }
   0x5   :  { %18 = vsyncpa [#allocation5 + $0x1], 0  ;;  %s2460_s21 = smov 0   ;;  %s2462_s22 = smov 0  }
   0x6   :  { %s2464_s23 = smov 0   ;;  %s2466_s24 = smov 0  }
   0x7 LB: > { %s2481_s25 = sadd.s32 4294967295, %s2407_s24   ;;  %s1713_s26 = sadd.s32 4294967294, %s2407_s24   ;;  %s2407_s24 = sphi %s2466_s24, %s3013_s24   ;;  %s2403_s23 = sphi %s2464_s23, %s3012_s23   ;;  %s2399_s22 = sphi %s2462_s22, %s3011_s22   ;;  %s2395_s21 = sphi %s2460_s21, %s3010_s21  }
   0x8   : > { %p44_p0 = scmp.ne.s32.totalorder %s2399_s22, %s2395_s21  ;;  %p2990_p1 = scmp.eq.s32.totalorder %s2481_s25, 0 }
   0x9   : > { %p179_p3 = scmp.eq.s32.totalorder %s1713_s26, 1  ;;  %p1714_p5 = scmp.ge.s32.totalorder %s2407_s24, 1 }
   0xa   : > { %p2490_p4 = por %p2990_p1, %p44_p0  ;;  %p186_p7 = scmp.lt.s32.totalorder %s2407_s24, 3 }
   0xb   : > { %p2495_p6 = por %p179_p3, %p44_p0  ;;  %s2409_s30 = smov [#allocation6]  }
   0xc   : > { %s2993_s27 = scalar_select %p2490_p4, 1, 0 }
   0xd   : > { %s2994_s28 = scalar_select %p2495_p6, 1, 0 }
   0xe   : > { %p2501_p9 = pnand %p1714_p5, %p186_p7  ;;  %s198_s7 = sshll.u32 %s2409_s30, 4  ;;  %s2505_s7 = int_to_ptr.vmem [resolvable:$true] %s198_s7 }
   0xf   : > { %s2410_s9 = smov [#allocation8]   ;;  %s2411_s11 = smov [#allocation9]  }
  0x10   : > { %s2995_s29 = scalar_select %p2501_p9, 1, 0 }
  0x11   : > { %p2011_p10 = pneg %p2501_p9  ;;  %s211_s10 = sshll.u32 %s2410_s9, 4  ;;  %s2516_s10 = int_to_ptr.vmem [resolvable:$true] %s211_s10 }
  0x12   : > { %s2518_s12 = sshll.u32 %s2411_s11, 4  ;;  %s2219_s15 = scalar_lea.hbm %s2984_s1, 256  ;;  %s228_s12 = int_to_ptr.vmem [resolvable:$true] %s2518_s12 }
  0x13   : > { %p2512_p12 = pnand %p2011_p10, %p2990_p1  ;;  %p2220_p13 = scmp.ne.s32.totalorder %s2984_s1, %s2219_s15 }
  0x14   : > { %p2226_p7 = scmp.lt.u32.totalorder %s2219_s15, %s2984_s1 }
  0x15   : > { %p2528_p0 = pneg %p2512_p12 }
  0x17   : > { %p2222_p3 = pnand %p2528_p0, %p2220_p13 }
  0x19   : > { %p2223_p5 = pneg %p2222_p3 }
  0x1b   : > { %p2228_p10 = pnand %p2226_p7, %p2223_p5 }
  0x1d   : > { %2231 = shalt.err (!%p2228_p10)
}
  0x1e   : > { %s2232_s26 = scalar_lea.vmem %s2505_s7, 256  ;;  %p2240_p2 = scmp.lt.s32.totalorder %s2505_s7, %s2505_s7 }
  0x1f   : > { %p2233_p11 = scmp.ne.s32.totalorder %s2505_s7, %s2232_s26  ;;  %p2241_p6 = scmp.lt.s32.totalorder %s2232_s26, %s2232_s26 }
  0x21   : > { %p2235_p8 = pnand %p2233_p11, %p2528_p0  ;;  %p2242_p13 = por %p2241_p6, %p2240_p2 }
  0x23   : > { %p2236_p1 = pneg %p2235_p8 }
  0x25   : > { %p2243_p3 = pnand %p2242_p13, %p2236_p1 }
  0x27   : > { %2246 = shalt.err (!%p2243_p3)
}
  0x28   : > { %s2412_s30 = smov 128   ;;  %s2413_s9 = smov 8  }
  0x29   : > { %2014 = dma.hbm_to_vmem [thread:$0]  (!%p2512_p12), %s2984_s1, 256, %s2505_s7, [#allocation7], %s2412_s30, %s2412_s30, %s2413_s9  }
  0x2a   : > { %s2247_s16 = scalar_lea.hbm %s2985_s2, 2048 }
  0x2b   : > { %p2248_p2 = scmp.ne.s32.totalorder %s2985_s2, %s2247_s16  ;;  %p2254_p8 = scmp.lt.u32.totalorder %s2247_s16, %s2985_s2 }
  0x2d   : > { %p2250_p1 = pnand %p2248_p2, %p2528_p0 }
  0x2f   : > { %p2251_p6 = pneg %p2250_p1 }
  0x31   : > { %p2256_p11 = pnand %p2254_p8, %p2251_p6 }
  0x33   : > { %2259 = shalt.err (!%p2256_p11)
}
  0x34   : > { %s2260_s7 = scalar_lea.vmem %s2516_s10, 2048  ;;  %p2268_p13 = scmp.lt.s32.totalorder %s2516_s10, %s2516_s10 }
  0x35   : > { %p2261_p5 = scmp.ne.s32.totalorder %s2516_s10, %s2260_s7  ;;  %p2269_p3 = scmp.lt.s32.totalorder %s2260_s7, %s2260_s7 }
  0x37   : > { %p2263_p7 = pnand %p2261_p5, %p2528_p0  ;;  %p2270_p2 = por %p2269_p3, %p2268_p13 }
  0x39   : > { %p2264_p10 = pneg %p2263_p7 }
  0x3b   : > { %p2271_p1 = pnand %p2270_p2, %p2264_p10 }
  0x3d   : > { %2274 = shalt.err (!%p2271_p1)
}
  0x3e   : > { %2017 = dma.hbm_to_vmem [thread:$0]  (!%p2512_p12), %s2985_s2, 2048, %s2516_s10, [#allocation7], %s2412_s30, %s2412_s30, %s2413_s9  }
  0x3f   : > { %s2275_s16 = scalar_lea.hbm %s2987_s4, 1024 }
  0x40   : > { %p2276_p6 = scmp.ne.s32.totalorder %s2987_s4, %s2275_s16  ;;  %p2282_p5 = scmp.lt.u32.totalorder %s2275_s16, %s2987_s4 }
  0x42   : > { %p2278_p8 = pnand %p2276_p6, %p2528_p0 }
  0x44   : > { %p2279_p11 = pneg %p2278_p8 }
  0x46   : > { %p2284_p7 = pnand %p2282_p5, %p2279_p11 }
  0x48   : > { %2287 = shalt.err (!%p2284_p7)
}
  0x49   : > { %s2288_s7 = scalar_lea.vmem %s228_s12, 1024  ;;  %p2296_p2 = scmp.lt.s32.totalorder %s228_s12, %s228_s12 }
  0x4a   : > { %p2289_p10 = scmp.ne.s32.totalorder %s228_s12, %s2288_s7  ;;  %p2297_p1 = scmp.lt.s32.totalorder %s2288_s7, %s2288_s7 }
  0x4c   : > { %p2291_p13 = pnand %p2289_p10, %p2528_p0  ;;  %p2298_p4 = por %p2297_p1, %p2296_p2 }
  0x4e   : > { %p2292_p3 = pneg %p2291_p13 }
  0x50   : > { %p2299_p9 = pnand %p2298_p4, %p2292_p3 }
  0x52   : > { %2302 = shalt.err (!%p2299_p9)
}
  0x53   : > { %s2414_s10 = smov 64   ;;  %s2415_s18 = smov 4  }
  0x54   : > { %2020 = dma.hbm_to_vmem [thread:$0]  (!%p2512_p12), %s2987_s4, 1024, %s228_s12, [#allocation10], %s2414_s10, %s2414_s10, %s2415_s18  }
  0x55   : > { %s2592_s11 = sadd.s32 1, %s2407_s24   ;;  %s31_s14 = sadd.s32 1, %s2403_s23 }
  0x56   : > { %s28_s13 = ssub.s32 %s2407_s24, %s2592_s11  ;;  %p38_p9 = scmp.ne.s32.totalorder %s2403_s23, %s2399_s22 }
  0x57   : > { %p29_p4 = scmp.eq.s32.totalorder %s28_s13, 0  ;;  %p39_p0 = scmp.eq.s32.totalorder %s2407_s24, 0 }
  0x58   : > { %p2032_p6 = scmp.lt.s32.totalorder %s2407_s24, 2  ;;  %p2998_p11 = scmp.eq.s32.totalorder %s2481_s25, 1 }
  0x59   : > { %s2602_s15 = scalar_select %p29_p4, %s2403_s23, %s31_s14  }
  0x5a   : > { %p40_p8 = por %p39_p0, %p38_p9  ;;  %p2606_p5 = por %p2998_p11, %p38_p9 }
  0x5b   : > { %s244_s8 = sand.u32 1, %s2403_s23   ;;  %s1993_s17 = smul.u32 3072, %s2407_s24 }
  0x5c   : > { %s1992_s12 = smul.u32 192, %s244_s8  ;;  %p2617_p12 = pnand %p2032_p6, %p40_p8 }
  0x5d   : > { %s2615_s26 = scalar_lea.hbm %s2983_s0, %s1993_s17  ;;  %s2623_s30 = scalar_lea.sflag [#allocation4], %s244_s8 }
  0x5e   : > { %s248_s10 = scalar_lea.vmem [#allocation3], %s1992_s12  ;;  %s2303_s9 = scalar_lea.hbm %s2615_s26, 3072 }
  0x5f   : > { %s256_s18 = sshll.u32 %s248_s10, 4  ;;  %p2304_p7 = scmp.ne.s32.totalorder %s2615_s26, %s2303_s9  ;;  %s2621_s18 = int_to_ptr.vmem [resolvable:$true] %s256_s18 }
  0x60   : > { %p2305_p10 = pneg %p2617_p12  ;;  %s2308_s17 = scalar_lea.hbm %s2983_s0, 6144 }
  0x61   : > { %p2309_p2 = scmp.lt.u32.totalorder %s2615_s26, %s2983_s0  ;;  %p2310_p1 = scmp.lt.u32.totalorder %s2308_s17, %s2303_s9 }
  0x62   : > { %p2306_p13 = pnand %p2305_p10, %p2304_p7  ;;  %p2312_p9 = scmp.lt.u32.totalorder %s2303_s9, %s2615_s26 }
  0x63   : > { %p2311_p4 = por %p2310_p1, %p2309_p2 }
  0x64   : > { %p2307_p3 = pneg %p2306_p13 }
  0x65   : > { %p2313_p0 = por %p2312_p9, %p2311_p4 }
  0x67   : > { %p2314_p6 = pnand %p2313_p0, %p2307_p3 }
  0x69   : > { %2317 = shalt.err (!%p2314_p6)
}
  0x6a   : > { %s2318_s8 = scalar_lea.vmem %s2621_s18, 3072  ;;  %s2416_s12 = smov [#allocation3]  }
  0x6b   : > { %p2319_p8 = scmp.ne.s32.totalorder %s2621_s18, %s2318_s8  ;;  %s2323_s10 = sshll.u32 %s2416_s12, 4  ;;  %s2324_s10 = int_to_ptr.vmem [resolvable:$false] %s2323_s10 }
  0x6c   : > { %s2325_s13 = scalar_lea.vmem %s2324_s10, 6144  ;;  %p2326_p13 = scmp.lt.s32.totalorder %s2621_s18, %s2324_s10 }
  0x6d   : > { %p2321_p11 = pnand %p2319_p8, %p2305_p10  ;;  %p2327_p2 = scmp.lt.s32.totalorder %s2325_s13, %s2318_s8 }
  0x6f   : > { %p2322_p7 = pneg %p2321_p11  ;;  %p2328_p1 = por %p2327_p2, %p2326_p13 }
  0x71   : > { %p2329_p4 = pnand %p2328_p1, %p2322_p7 }
  0x73   : > { %2332 = shalt.err (!%p2329_p4)
}
  0x74   : > { %s2417_s9 = smov 384   ;;  %s2418_s14 = smov 24  }
  0x75   : > { %2024 = dma.hbm_to_vmem [thread:$0]  (!%p2617_p12), %s2615_s26, 3072, %s2621_s18, %s2623_s30, %s2417_s9, %s2417_s9, %s2418_s14  }
  0x76   : > { %p3001_p10 = scmp.ne.s32.totalorder %s2995_s29, 0 }
  0x77   : > { %s2654_s17 = sand.u32 (!%p3001_p10), 1, %s2399_s22   ;;  %p3002_p3 = scmp.ne.s32.totalorder (!%p3001_p10), %s2993_s27, 0 }
  0x78   : > { %268 = sbr.rel (%p3001_p10) target bundleno = 2130 (0x852), region = 44  ;;  %s271_s20 = scalar_lea.sflag (!%p3001_p10), [#allocation4], %s2654_s17 }
  0x79   : > { %s1994_s19 = smul.u32 (!%p3001_p10), 192, %s2654_s17 }
  0x7b   : > { %s2658_s8 = scalar_lea.vmem (!%p3001_p10), [#allocation3], %s1994_s19 }
  0x7f   : > { %2378 = dma.done.wait (%p3002_p3), %s271_s20, 3072  }
  0x80   : > { %2380 = vsyncadd (%p3002_p3), %s271_s20, 4294964224  ;;  %p3003_p12 = scmp.eq.s32.totalorder %s2481_s25, 0 }
  0x82   : > { %2382 = dma.done.wait (%p3003_p12), [#allocation7], 2304   ;;  %p3004_p9 = pmov %p3003_p12 }
  0x84   : > { %2384 = vsyncadd (%p3004_p9), [#allocation7], 4294964992  ;;  %p3005_p0 = pmov %p3004_p9 }
  0x86   : > { %2386 = dma.done.wait (%p3005_p0), [#allocation10], 1024   ;;  %p3006_p6 = pmov %p3005_p0 }
  0x87   : > { %s1726_s29 = sshll.u32 %s2654_s17, 6  ;;  %p3007_p8 = scmp.ne.s32.totalorder %s2481_s25, 0 }
  0x88   : > { %2388 = vsyncadd (%p3006_p6), [#allocation10], 4294966272  ;;  %s2673_s26 = scalar_lea.vmem [#allocation11], %s1726_s29  ;;  %v322_v0 = vld [vmem:[#allocation6] sm:$0xff] (!%p3007_p8)  ;;  %v323_v1 = vld [vmem:[#allocation6 + $0x8] sm:$0xff] (!%p3007_p8) }
  0x89   : > { %321 = sbr.rel (%p3007_p8) target bundleno = 144 (0x90), region = 64  ;;  %324 = vst [vmem:[#allocation2] sm:$0xff] (!%p3007_p8), %v322_v0  ;;  %325 = vst [vmem:[#allocation2 + $0x8] sm:$0xff] (!%p3007_p8), %v323_v1 }
  0x90 PF: > { %v2677_v2 = vld [vmem:[#allocation8 + $0x4] ss:$8 sps:$4 sm:$0xff]   ;;  %v2679_v3 = vld [vmem:[#allocation8] ss:$8 sps:$4 sm:$0xff]   ;;  %v2419_v4 = vmov 0   ;;  %v2420_v23 = vmov 0.0   ;;  %v353_v31 = vlaneseq }
  0x91   : > { %475 = vmatprep.mubr.bf16.mxu0 %v2419_v4  ;;  %443 = vmatprep.subr.bf16.mxu0 %v2677_v2  ;;  %v2683_v5 = vld [vmem:[#allocation8 + $0x14] ss:$8 sps:$4 sm:$0xff]   ;;  %v2686_v6 = vld [vmem:[#allocation8 + $0x10] ss:$8 sps:$4 sm:$0xff]   ;;  %v2689_v7 = vld [vmem:[#allocation8 + $0x24] ss:$8 sps:$4 sm:$0xff]  }
  0x92   : > { %444 = vmatpush1.bf16.msra.mxu0 %v2679_v3  ;;  %v2692_v8 = vld [vmem:[#allocation8 + $0x20] ss:$8 sps:$4 sm:$0xff]   ;;  %v2695_v9 = vld [vmem:[#allocation8 + $0x34] ss:$8 sps:$4 sm:$0xff]   ;;  %v2698_v10 = vld [vmem:[#allocation8 + $0x30] ss:$8 sps:$4 sm:$0xff]   ;;  %1912 = vmatprep.subr.bf16.mxu1 %v2420_v23 }
  0x93   : > { %445 = vmatprep.subr.bf16.mxu0 %v2683_v5  ;;  %v2700_v11 = vld [vmem:[#allocation8 + $0x44] ss:$8 sps:$4 sm:$0xff]   ;;  %v2703_v12 = vld [vmem:[#allocation8 + $0x40] ss:$8 sps:$4 sm:$0xff]   ;;  %v2705_v13 = vld [vmem:[#allocation8 + $0x54] ss:$8 sps:$4 sm:$0xff]  }
  0x94   : > { %v2709_v14 = vld [vmem:[#allocation8 + $0x50] ss:$8 sps:$4 sm:$0xff]   ;;  %v2711_v15 = vld [vmem:[#allocation8 + $0x64] ss:$8 sps:$4 sm:$0xff]   ;;  %v2715_v16 = vld [vmem:[#allocation8 + $0x60] ss:$8 sps:$4 sm:$0xff]  }
  0x95   : > { %v2717_v17 = vld [vmem:[#allocation8 + $0x74] ss:$8 sps:$4 sm:$0xff]   ;;  %v2721_v18 = vld [vmem:[#allocation8 + $0x70] ss:$8 sps:$4 sm:$0xff]   ;;  %v2723_v19 = vld [vmem:[#allocation2] sm:$0xff]  ;;  %vm2421_vm0 = vmmov 0  }
  0x96   : > { %446 = vmatpush1.bf16.msra.mxu0 %v2686_v6  ;;  %v2725_v20 = vld [vmem:[#allocation2 + $0x8] sm:$0xff]  ;;  %v2107_v22 = vld [vmem:[#allocation9] sm:$0xff]   ;;  %v2109_v25 = vld [vmem:[#allocation9 + $0x10] sm:$0xff]   ;;  %1928 = vmatprep.mubr.msk.bf16.mxu1 %vm2421_vm0, %v2420_v23  ;;  %v354_v32 = vshrl.u32 %v353_v31, 7  ;;  %s1875_s20 = sshll.u32 %s2481_s25, 10  ;;  %s1597_s25 = scalar_lea.sflag [#allocation5], %s2654_s17 }
  0x97   : > { %447 = vmatprep.subr.bf16.mxu0 %v2689_v7  ;;  %v334_v21 = vpack.c.bf16 %v2725_v20, %v2723_v19  ;;  %1913 = vmatpush3.bf16.msra.mxu1 %v2107_v22  ;;  %v2108_v24 = vld [vmem:[#allocation9 + $0x8] sm:$0xff]   ;;  %v2110_v26 = vld [vmem:[#allocation9 + $0x18] sm:$0xff]   ;;  %v2111_v27 = vld [vmem:[#allocation9 + $0x20] sm:$0xff]   ;;  %s2935_s7 = scalar_lea.hbm %s2989_s6, %s1875_s20  ;;  %s2422_s30 = smov [#allocation11]  }
  0x98   : > { %1914 = vmatprep.subr.bf16.mxu1 %v2420_v23  ;;  %v2112_v28 = vld [vmem:[#allocation9 + $0x28] sm:$0xff]   ;;  %v2113_v29 = vld [vmem:[#allocation9 + $0x30] sm:$0xff]   ;;  %v2114_v30 = vld [vmem:[#allocation9 + $0x38] sm:$0xff]   ;;  %v2761_v33 = vsub.s32 0, %v354_v32  ;;  %v2773_v57 = vsub.s32 1, %v354_v32  ;;  %s2337_s12 = sshll.u32 %s2422_s30, 4  ;;  %s2338_s12 = int_to_ptr.vmem [resolvable:$false] %s2337_s12 }
  0x99   : > { %v351_v34 = vld [vmem:[%s2986_s3] sm:$0x3]  ;;  %v328_v36 = vld [vmem:[%s2658_s8] sm:$0xff]  ;;  %v331_v40 = vld [vmem:[%s2658_s8 + $0x18] sm:$0xff]  ;;  %s2339_s10 = scalar_lea.vmem %s2338_s12, 2048 }
  0x9a   : > { %448 = vmatpush1.bf16.msra.mxu0 %v2692_v8  ;;  %v356_v35 = vrot.slane %v351_v34, %v2761_v33  ;;  %v360_v58 = vrot.slane %v351_v34, %v2773_v57  ;;  %v329_v60 = vld [vmem:[%s2658_s8 + $0x8] sm:$0xff]  ;;  %v332_v63 = vld [vmem:[%s2658_s8 + $0x20] sm:$0xff]  ;;  %v330_v22 = vld [vmem:[%s2658_s8 + $0x10] sm:$0xff] }
  0x9b   : > { %449 = vmatprep.subr.bf16.mxu0 %v2695_v9  ;;  %1915 = vmatpush3.bf16.msra.mxu1 %v2108_v24 }
  0x9c   : > { %1916 = vmatprep.subr.bf16.mxu1 %v2420_v23 }
  0x9e   : > { %450 = vmatpush1.bf16.msra.mxu0 %v2698_v10 }
  0x9f   : > { %451 = vmatprep.subr.bf16.mxu0 %v2700_v11  ;;  %1917 = vmatpush3.bf16.msra.mxu1 %v2109_v25 }
  0xa0   : > { %1918 = vmatprep.subr.bf16.mxu1 %v2420_v23 }
  0xa2   : > { %452 = vmatpush1.bf16.msra.mxu0 %v2703_v12 }
  0xa3   : > { %453 = vmatprep.subr.bf16.mxu0 %v2705_v13  ;;  %1919 = vmatpush3.bf16.msra.mxu1 %v2110_v26  ;;  %v2782_v26 = vld [vmem:[%s2988_s5] ss:$0 sm:$0xff] }
  0xa4   : > { %1920 = vmatprep.subr.bf16.mxu1 %v2420_v23 }
  0xa6   : > { %454 = vmatpush1.bf16.msra.mxu0 %v2709_v14 }
  0xa7   : > { %455 = vmatprep.subr.bf16.mxu0 %v2711_v15  ;;  %1921 = vmatpush3.bf16.msra.mxu1 %v2111_v27  ;;  %v333_v27 = vld [vmem:[%s2658_s8 + $0x28] sm:$0xff] }
  0xa8   : > { %1922 = vmatprep.subr.bf16.mxu1 %v2420_v23 }
  0xaa   : > { %456 = vmatpush1.bf16.msra.mxu0 %v2715_v16 }
  0xab   : > { %457 = vmatprep.subr.bf16.mxu0 %v2717_v17  ;;  %1923 = vmatpush3.bf16.msra.mxu1 %v2112_v28 }
  0xac   : > { %1924 = vmatprep.subr.bf16.mxu1 %v2420_v23 }
  0xae   : > { %458 = vmatpush1.bf16.msra.mxu0 %v2721_v18 }
  0xaf   : > { %759 = vmatprep.subr.bf16.mxu0 %v2677_v2  ;;  %1925 = vmatpush3.bf16.msra.mxu1 %v2113_v29 }
  0xb0   : > { %1926 = vmatprep.subr.bf16.mxu1 %v2420_v23 }
  0xb1   : > { %476 = vmatmul.mubr.bf16.vlgmr.msra.gmra.mrb[0].mxu0 %v334_v21 }
  0xb2   : > { %760 = vmatpush1.bf16.msra.mxu0 %v2679_v3  ;;  %791 = vmatprep.mubr.bf16.mxu0 %v2419_v4 }
  0xb3   : > { %761 = vmatprep.subr.bf16.mxu0 %v2683_v5  ;;  %1927 = vmatpush3.bf16.msra.mxu1 %v2114_v30 }
  0xb4   : > { %1932 = vmatprep.subr.bf16.mxu1 %v2420_v23 }
  0xb6   : > { %762 = vmatpush1.bf16.msra.mxu0 %v2686_v6 }
  0xb7   : > { %763 = vmatprep.subr.bf16.mxu0 %v2689_v7 }
  0xba   : > { %764 = vmatpush1.bf16.msra.mxu0 %v2692_v8 }
  0xbb   : > { %765 = vmatprep.subr.bf16.mxu0 %v2695_v9 }
  0xbe   : > { %766 = vmatpush1.bf16.msra.mxu0 %v2698_v10 }
  0xbf   : > { %767 = vmatprep.subr.bf16.mxu0 %v2700_v11 }
  0xc2   : > { %768 = vmatpush1.bf16.msra.mxu0 %v2703_v12 }
  0xc3   : > { %769 = vmatprep.subr.bf16.mxu0 %v2705_v13 }
  0xc6   : > { %770 = vmatpush1.bf16.msra.mxu0 %v2709_v14 }
  0xc7   : > { %771 = vmatprep.subr.bf16.mxu0 %v2711_v15 }
  0xca   : > { %772 = vmatpush1.bf16.msra.mxu0 %v2715_v16 }
  0xcb   : > { %773 = vmatprep.subr.bf16.mxu0 %v2717_v17 }
  0xce   : > { %774 = vmatpush1.bf16.msra.mxu0 %v2721_v18 }
  0xcf   : > { %1076 = vmatprep.subr.bf16.mxu0 %v2677_v2 }
 0x184   : > { %v477_v37 = vpop.f32.mrb[0].mxu0 }
 0x185   : > { %v478_v38 = vadd.f32 %v477_v37, %v356_v35  ;;  %v479_v39 = vpop.f32.mrb[1].mxu0 }
 0x186   : > { %v481_v41 = vpop.f32.mrb[2].mxu0  ;;  %v480_v59 = vadd.f32 %v479_v39, %v360_v58 }
 0x187   : > { %v486_v42 = vadd.f32 %v478_v38, %v328_v36  ;;  %v482_v43 = vadd.f32 %v481_v41, %v356_v35  ;;  %v483_v44 = vpop.f32.mrb[3].mxu0 }
 0x188   : > { %v484_v61 = vadd.f32 %v483_v44, %v360_v58  ;;  %v500_v62 = vadd.f32 %v480_v59, %v329_v60  ;;  %v1757_v58 = vld [vmem:[%s2658_s8 + $0x30] sm:$0xff] }
 0x189   : > { %v1744_v45 = vmul.f32 -1.442695, %v486_v42  ;;  %v487_v46 = vadd.f32 %v482_v43, %v331_v40 }
 0x18a   : > { %v501_v0 = vadd.f32 %v484_v61, %v332_v63  ;;  %v1746_v1 = vmul.f32 -1.442695, %v500_v62  ;;  %v1760_v62 = vld [vmem:[%s2658_s8 + $0x48] sm:$0xff] }
 0x18b   : > { %2139 = vpow2.f32 %v1744_v45  ;;  %v1745_v47 = vmul.f32 -1.442695, %v487_v46 }
 0x18c   : > { %v1747_v21 = vmul.f32 -1.442695, %v501_v0 }
 0x18d   : > { %2141 = vpow2.f32 %v1745_v47 }
 0x195   : > { %v2140_v48 = vpop.eup %2139 }
 0x196   : > { %v494_v49 = vadd.f32 1.0, %v2140_v48 }
 0x197   : > { %v2142_v50 = vpop.eup %2141 }
 0x198   : > { %2143 = vrcp.f32 %v494_v49  ;;  %v495_v51 = vadd.f32 1.0, %v2142_v50  ;;  %v2117_v50 = vld [vmem:[#allocation9 + $0x10] sm:$0xff]  }
 0x19a   : > { %2145 = vrcp.f32 %v495_v51  ;;  %v2118_v51 = vld [vmem:[#allocation9 + $0x18] sm:$0xff]  }
 0x19b   : > { %2147 = vpow2.f32 %v1746_v1 }
 0x19c   : > { %2149 = vpow2.f32 %v1747_v21 }
 0x1a2   : > { %v2144_v52 = vpop.eup %2143 }
 0x1a3   : > { %v514_v54 = vmul.f32 %v2144_v52, %v2723_v19  ;;  %v2119_v52 = vld [vmem:[#allocation9 + $0x20] sm:$0xff]  }
 0x1a4   : > { %v2146_v53 = vpop.eup %2145 }
 0x1a5   : > { %v515_v55 = vmul.f32 %v2146_v53, %v2725_v20  ;;  %v2148_v24 = vpop.eup %2147  ;;  %v2121_v53 = vld [vmem:[#allocation9 + $0x30] sm:$0xff]  }
 0x1a6   : > { %v2150_v30 = vpop.eup %2149  ;;  %v508_v31 = vadd.f32 1.0, %v2148_v24 }
 0x1a7   : > { %v516_v56 = vpack.c.bf16 %v515_v55, %v514_v54  ;;  %v509_v37 = vadd.f32 1.0, %v2150_v30  ;;  %v2122_v54 = vld [vmem:[#allocation9 + $0x38] sm:$0xff]   ;;  %v667_v55 = vld [vmem:[%s2986_s3] sm:$0x3] }
 0x1a9   : > { %1929 = vmatmul.mubr.bf16.vlgmr.msra.gmra.mrb[0].mxu1 %v516_v56  ;;  %v672_v56 = vrot.slane %v667_v55, %v2761_v33 }
 0x1aa   : > { %1948 = vmatprep.mubr.msk.bf16.mxu1 %vm2421_vm0, %v2420_v23 }
 0x27c   : > { %v615_v25 = vpop.f32.mrb[0].mxu1 }
 0x27d   : > { %v622_v28 = vadd.f32 %v615_v25, %v330_v22  ;;  %v1930_v29 = vpop.f32.mrb[1].mxu1 }
 0x27e   : > { %v618_v32 = vpop.f32.mrb[2].mxu1 }
 0x27f   : > { %v631_v34 = vadd.f32 %v2782_v26, %v622_v28  ;;  %v623_v35 = vadd.f32 %v618_v32, %v333_v27  ;;  %v1931_v36 = vpop.f32.mrb[3].mxu1 }
 0x281   : > { %2151 = vtanh.f32 %v631_v34  ;;  %v632_v38 = vadd.f32 %v2782_v26, %v623_v35 }
 0x282   : > { %2153 = vrcp.f32 %v508_v31 }
 0x283   : > { %2155 = vtanh.f32 %v632_v38 }
 0x284   : > { %2157 = vrcp.f32 %v509_v37  ;;  %v676_v37 = vrot.slane %v667_v55, %v2773_v57 }
 0x28b   : > { %v2152_v39 = vpop.eup %2151 }
 0x28c   : > { %v2154_v40 = vpop.eup %2153  ;;  %v635_v41 = vsub.f32 %v2723_v19, %v2152_v39  ;;  %v2115_v19 = vld [vmem:[#allocation9] sm:$0xff]  }
 0x28d   : > { %v2156_v42 = vpop.eup %2155  ;;  %1933 = vmatpush3.bf16.msra.mxu1 %v2115_v19 }
 0x28e   : > { %v637_v43 = vmul.f32 %v2154_v40, %v635_v41  ;;  %v636_v44 = vsub.f32 %v2725_v20, %v2156_v42  ;;  %v2158_v45 = vpop.eup %2157  ;;  %1934 = vmatprep.subr.bf16.mxu1 %v2420_v23  ;;  %v2116_v20 = vld [vmem:[#allocation9 + $0x8] sm:$0xff]  }
 0x290   : > { %v2789_v46 = vadd.f32 %v2152_v39, %v637_v43  ;;  %v638_v47 = vmul.f32 %v2158_v45, %v636_v44  ;;  %v1758_v39 = vld [vmem:[%s2658_s8 + $0x38] sm:$0xff] }
 0x291   : > { %1935 = vmatpush3.bf16.msra.mxu1 %v2116_v20  ;;  %v1762_v20 = vld [vmem:[%s2658_s8 + $0x58] sm:$0xff] }
 0x292   : > { %641 = vst [vmem:[%s2673_s26] sm:$0xff] %v2789_v46  ;;  %v2793_v48 = vadd.f32 %v2156_v42, %v638_v47  ;;  %1936 = vmatprep.subr.bf16.mxu1 %v2420_v23  ;;  %v1761_v42 = vld [vmem:[%s2658_s8 + $0x50] sm:$0xff]  ;;  %v1759_v47 = vld [vmem:[%s2658_s8 + $0x40] sm:$0xff] }
 0x294   : > { %642 = vst [vmem:[%s2673_s26 + $0x8] sm:$0xff] %v2793_v48  ;;  %v650_v49 = vpack.c.bf16 %v2793_v48, %v2789_v46 }
 0x295   : > { %1937 = vmatpush3.bf16.msra.mxu1 %v2117_v50 }
 0x296   : > { %792 = vmatmul.mubr.bf16.vlgmr.msra.gmra.mrb[4].mxu0 %v650_v49  ;;  %1938 = vmatprep.subr.bf16.mxu1 %v2420_v23 }
 0x297   : > { %1077 = vmatpush1.bf16.msra.mxu0 %v2679_v3  ;;  %1108 = vmatprep.mubr.bf16.mxu0 %v2419_v4 }
 0x298   : > { %1078 = vmatprep.subr.bf16.mxu0 %v2683_v5 }
 0x299   : > { %1939 = vmatpush3.bf16.msra.mxu1 %v2118_v51 }
 0x29a   : > { %1940 = vmatprep.subr.bf16.mxu1 %v2420_v23 }
 0x29b   : > { %1079 = vmatpush1.bf16.msra.mxu0 %v2686_v6 }
 0x29c   : > { %1080 = vmatprep.subr.bf16.mxu0 %v2689_v7 }
 0x29d   : > { %1941 = vmatpush3.bf16.msra.mxu1 %v2119_v52 }
 0x29e   : > { %1942 = vmatprep.subr.bf16.mxu1 %v2420_v23 }
 0x29f   : > { %1081 = vmatpush1.bf16.msra.mxu0 %v2692_v8 }
 0x2a0   : > { %1082 = vmatprep.subr.bf16.mxu0 %v2695_v9 }
 0x2a3   : > { %1083 = vmatpush1.bf16.msra.mxu0 %v2698_v10 }
 0x2a4   : > { %1084 = vmatprep.subr.bf16.mxu0 %v2700_v11 }
 0x2a7   : > { %1085 = vmatpush1.bf16.msra.mxu0 %v2703_v12 }
 0x2a8   : > { %1086 = vmatprep.subr.bf16.mxu0 %v2705_v13 }
 0x2ab   : > { %1087 = vmatpush1.bf16.msra.mxu0 %v2709_v14 }
 0x2ac   : > { %1088 = vmatprep.subr.bf16.mxu0 %v2711_v15 }
 0x2af   : > { %1089 = vmatpush1.bf16.msra.mxu0 %v2715_v16 }
 0x2b0   : > { %1090 = vmatprep.subr.bf16.mxu0 %v2717_v17 }
 0x2b3   : > { %1091 = vmatpush1.bf16.msra.mxu0 %v2721_v18 }
 0x2b4   : > { %1393 = vmatprep.subr.bf16.mxu0 %v2677_v2  ;;  %v2120_v2 = vld [vmem:[#allocation9 + $0x28] sm:$0xff]  }
 0x2b5   : > { %1943 = vmatpush3.bf16.msra.mxu1 %v2120_v2 }
 0x2b6   : > { %1944 = vmatprep.subr.bf16.mxu1 %v2420_v23 }
 0x2b9   : > { %1945 = vmatpush3.bf16.msra.mxu1 %v2121_v53 }
 0x2ba   : > { %1946 = vmatprep.subr.bf16.mxu1 %v2420_v23 }
 0x2bd   : > { %1947 = vmatpush3.bf16.msra.mxu1 %v2122_v54 }
 0x2be   : > { %1952 = vmatprep.subr.bf16.mxu1 %v2420_v23 }
 0x369   : > { %v793_v59 = vpop.f32.mrb[4].mxu0 }
 0x36a   : > { %v794_v60 = vadd.f32 %v793_v59, %v672_v56  ;;  %v795_v61 = vpop.f32.mrb[5].mxu0 }
 0x36b   : > { %v797_v63 = vpop.f32.mrb[6].mxu0  ;;  %v796_v38 = vadd.f32 %v795_v61, %v676_v37 }
 0x36c   : > { %v802_v0 = vadd.f32 %v1757_v58, %v794_v60  ;;  %v798_v1 = vadd.f32 %v797_v63, %v672_v56  ;;  %v799_v21 = vpop.f32.mrb[7].mxu0 }
 0x36d   : > { %v800_v40 = vadd.f32 %v799_v21, %v676_v37  ;;  %v816_v41 = vadd.f32 %v1758_v39, %v796_v38 }
 0x36e   : > { %v1779_v22 = vmul.f32 -1.442695, %v802_v0  ;;  %v803_v24 = vadd.f32 %v1760_v62, %v798_v1 }
 0x36f   : > { %v817_v43 = vadd.f32 %v1761_v42, %v800_v40  ;;  %v1781_v44 = vmul.f32 -1.442695, %v816_v41 }
 0x370   : > { %2159 = vpow2.f32 %v1779_v22  ;;  %v1780_v25 = vmul.f32 -1.442695, %v803_v24 }
 0x371   : > { %v1782_v45 = vmul.f32 -1.442695, %v817_v43 }
 0x372   : > { %2161 = vpow2.f32 %v1780_v25 }
 0x37a   : > { %v2160_v27 = vpop.eup %2159 }
 0x37b   : > { %v810_v28 = vadd.f32 1.0, %v2160_v27 }
 0x37c   : > { %v2162_v29 = vpop.eup %2161 }
 0x37d   : > { %2163 = vrcp.f32 %v810_v28  ;;  %v811_v30 = vadd.f32 1.0, %v2162_v29 }
 0x37f   : > { %2165 = vrcp.f32 %v811_v30 }
 0x380   : > { %2167 = vpow2.f32 %v1781_v44  ;;  %v1795_v44 = vld [vmem:[%s2658_s8 + $0x68] sm:$0xff] }
 0x381   : > { %2169 = vpow2.f32 %v1782_v45 }
 0x387   : > { %v2164_v31 = vpop.eup %2163 }
 0x388   : > { %v830_v34 = vmul.f32 %v2164_v31, %v2789_v46 }
 0x389   : > { %v2166_v32 = vpop.eup %2165 }
 0x38a   : > { %v831_v35 = vmul.f32 %v2166_v32, %v2793_v48  ;;  %v2168_v49 = vpop.eup %2167 }
 0x38b   : > { %v2170_v52 = vpop.eup %2169  ;;  %v824_v2 = vadd.f32 1.0, %v2168_v49  ;;  %v1798_v49 = vld [vmem:[%s2658_s8 + $0x80] sm:$0xff] }
 0x38c   : > { %v832_v36 = vpack.c.bf16 %v831_v35, %v830_v34  ;;  %v825_v58 = vadd.f32 1.0, %v2170_v52 }
 0x38e   : > { %1949 = vmatmul.mubr.bf16.vlgmr.msra.gmra.mrb[4].mxu1 %v832_v36 }
 0x38f   : > { %1968 = vmatprep.mubr.msk.bf16.mxu1 %vm2421_vm0, %v2420_v23 }
 0x461   : > { %v931_v19 = vpop.f32.mrb[4].mxu1 }
 0x462   : > { %v938_v50 = vadd.f32 %v1759_v47, %v931_v19  ;;  %v1950_v51 = vpop.f32.mrb[5].mxu1 }
 0x463   : > { %v934_v53 = vpop.f32.mrb[6].mxu1  ;;  %v1796_v51 = vld [vmem:[%s2658_s8 + $0x70] sm:$0xff] }
 0x464   : > { %v947_v54 = vadd.f32 %v2782_v26, %v938_v50  ;;  %v939_v55 = vadd.f32 %v1762_v20, %v934_v53  ;;  %v1951_v56 = vpop.f32.mrb[7].mxu1  ;;  %v1799_v53 = vld [vmem:[%s2658_s8 + $0x88] sm:$0xff] }
 0x466   : > { %2171 = vtanh.f32 %v947_v54  ;;  %v948_v59 = vadd.f32 %v2782_v26, %v939_v55 }
 0x467   : > { %2173 = vrcp.f32 %v824_v2 }
 0x468   : > { %2175 = vtanh.f32 %v948_v59 }
 0x469   : > { %2177 = vrcp.f32 %v825_v58 }
 0x470   : > { %v2172_v60 = vpop.eup %2171 }
 0x471   : > { %v2174_v61 = vpop.eup %2173  ;;  %v951_v62 = vsub.f32 %v2789_v46, %v2172_v60 }
 0x472   : > { %v2176_v63 = vpop.eup %2175 }
 0x473   : > { %v953_v0 = vmul.f32 %v2174_v61, %v951_v62  ;;  %v952_v1 = vsub.f32 %v2793_v48, %v2176_v63  ;;  %v2178_v21 = vpop.eup %2177 }
 0x475   : > { %v2843_v22 = vadd.f32 %v2172_v60, %v953_v0  ;;  %v954_v24 = vmul.f32 %v2178_v21, %v952_v1 }
 0x477   : > { %1792 = vst [vmem:[%s2673_s26 + $0x10] sm:$0xff] %v2843_v22  ;;  %v2847_v25 = vadd.f32 %v2176_v63, %v954_v24 }
 0x479   : > { %1793 = vst [vmem:[%s2673_s26 + $0x18] sm:$0xff] %v2847_v25  ;;  %v967_v27 = vpack.c.bf16 %v2847_v25, %v2843_v22 }
 0x47b   : > { %1109 = vmatmul.mubr.bf16.vlgmr.msra.gmra.mrb[8].mxu0 %v967_v27 }
 0x47c   : > { %1394 = vmatpush1.bf16.msra.mxu0 %v2679_v3  ;;  %1425 = vmatprep.mubr.bf16.mxu0 %v2419_v4  ;;  %v2123_v3 = vld [vmem:[#allocation9] sm:$0xff]   ;;  %v2124_v4 = vld [vmem:[#allocation9 + $0x8] sm:$0xff]  }
 0x47d   : > { %1395 = vmatprep.subr.bf16.mxu0 %v2683_v5  ;;  %1953 = vmatpush3.bf16.msra.mxu1 %v2123_v3  ;;  %v2125_v5 = vld [vmem:[#allocation9 + $0x10] sm:$0xff]  }
 0x47e   : > { %1954 = vmatprep.subr.bf16.mxu1 %v2420_v23 }
 0x480   : > { %1396 = vmatpush1.bf16.msra.mxu0 %v2686_v6  ;;  %v2126_v6 = vld [vmem:[#allocation9 + $0x18] sm:$0xff]  }
 0x481   : > { %1397 = vmatprep.subr.bf16.mxu0 %v2689_v7  ;;  %1955 = vmatpush3.bf16.msra.mxu1 %v2124_v4  ;;  %v2127_v7 = vld [vmem:[#allocation9 + $0x20] sm:$0xff]  }
 0x482   : > { %1956 = vmatprep.subr.bf16.mxu1 %v2420_v23 }
 0x484   : > { %1398 = vmatpush1.bf16.msra.mxu0 %v2692_v8  ;;  %v2128_v8 = vld [vmem:[#allocation9 + $0x28] sm:$0xff]  }
 0x485   : > { %1399 = vmatprep.subr.bf16.mxu0 %v2695_v9  ;;  %1957 = vmatpush3.bf16.msra.mxu1 %v2125_v5  ;;  %v2129_v9 = vld [vmem:[#allocation9 + $0x30] sm:$0xff]  }
 0x486   : > { %1958 = vmatprep.subr.bf16.mxu1 %v2420_v23 }
 0x488   : > { %1400 = vmatpush1.bf16.msra.mxu0 %v2698_v10  ;;  %v2130_v10 = vld [vmem:[#allocation9 + $0x38] sm:$0xff]  }
 0x489   : > { %1401 = vmatprep.subr.bf16.mxu0 %v2700_v11  ;;  %1959 = vmatpush3.bf16.msra.mxu1 %v2126_v6  ;;  %v984_v11 = vld [vmem:[%s2986_s3] sm:$0x3] }
 0x48a   : > { %1960 = vmatprep.subr.bf16.mxu1 %v2420_v23  ;;  %v993_v42 = vrot.slane %v984_v11, %v2773_v57 }
 0x48c   : > { %1402 = vmatpush1.bf16.msra.mxu0 %v2703_v12  ;;  %v989_v12 = vrot.slane %v984_v11, %v2761_v33  ;;  %v2134_v11 = vld [vmem:[#allocation9 + $0x18] sm:$0xff]  }
 0x48d   : > { %1403 = vmatprep.subr.bf16.mxu0 %v2705_v13  ;;  %1961 = vmatpush3.bf16.msra.mxu1 %v2127_v7  ;;  %v1794_v13 = vld [vmem:[%s2658_s8 + $0x60] sm:$0xff] }
 0x48e   : > { %1962 = vmatprep.subr.bf16.mxu1 %v2420_v23 }
 0x490   : > { %1404 = vmatpush1.bf16.msra.mxu0 %v2709_v14 }
 0x491   : > { %1405 = vmatprep.subr.bf16.mxu0 %v2711_v15  ;;  %1963 = vmatpush3.bf16.msra.mxu1 %v2128_v8 }
 0x492   : > { %1964 = vmatprep.subr.bf16.mxu1 %v2420_v23 }
 0x494   : > { %1406 = vmatpush1.bf16.msra.mxu0 %v2715_v16 }
 0x495   : > { %1407 = vmatprep.subr.bf16.mxu0 %v2717_v17  ;;  %1965 = vmatpush3.bf16.msra.mxu1 %v2129_v9  ;;  %v1797_v17 = vld [vmem:[%s2658_s8 + $0x78] sm:$0xff] }
 0x496   : > { %1966 = vmatprep.subr.bf16.mxu1 %v2420_v23 }
 0x498   : > { %1408 = vmatpush1.bf16.msra.mxu0 %v2721_v18 }
 0x499   : > { %1967 = vmatpush3.bf16.msra.mxu1 %v2130_v10  ;;  %v2131_v10 = vld [vmem:[#allocation9] sm:$0xff]  }
 0x49a   : > { %1972 = vmatprep.subr.bf16.mxu1 %v2420_v23 }
 0x54e   : > { %v1110_v14 = vpop.f32.mrb[8].mxu0 }
 0x54f   : > { %v1111_v15 = vadd.f32 %v1110_v14, %v989_v12  ;;  %v1112_v16 = vpop.f32.mrb[9].mxu0  ;;  %v2137_v14 = vld [vmem:[#allocation9 + $0x30] sm:$0xff]  }
 0x550   : > { %v1114_v18 = vpop.f32.mrb[10].mxu0  ;;  %v1113_v43 = vadd.f32 %v1112_v16, %v993_v42  ;;  %v1301_v16 = vld [vmem:[%s2986_s3] sm:$0x3] }
 0x551   : > { %v1119_v46 = vadd.f32 %v1794_v13, %v1111_v15  ;;  %v1115_v48 = vadd.f32 %v1114_v18, %v989_v12  ;;  %v1116_v28 = vpop.f32.mrb[11].mxu0  ;;  %v2135_v12 = vld [vmem:[#allocation9 + $0x20] sm:$0xff]   ;;  %v2136_v13 = vld [vmem:[#allocation9 + $0x28] sm:$0xff]   ;;  %v2138_v15 = vld [vmem:[#allocation9 + $0x38] sm:$0xff]  }
 0x552   : > { %v1117_v45 = vadd.f32 %v1116_v28, %v993_v42  ;;  %v1133_v47 = vadd.f32 %v1795_v44, %v1113_v43  ;;  %v1831_v18 = vld [vmem:[%s2658_s8 + $0x90] sm:$0xff] }
 0x553   : > { %v1816_v29 = vmul.f32 -1.442695, %v1119_v46  ;;  %v1120_v30 = vadd.f32 %v1797_v17, %v1115_v48  ;;  %v1306_v17 = vrot.slane %v1301_v16, %v2761_v33 }
 0x554   : > { %v1134_v19 = vadd.f32 %v1798_v49, %v1117_v45  ;;  %v1818_v20 = vmul.f32 -1.442695, %v1133_v47  ;;  %v1310_v45 = vrot.slane %v1301_v16, %v2773_v57  ;;  %v1832_v49 = vld [vmem:[%s2658_s8 + $0x98] sm:$0xff] }
 0x555   : > { %2179 = vpow2.f32 %v1816_v29  ;;  %v1817_v31 = vmul.f32 -1.442695, %v1120_v30  ;;  %v1834_v29 = vld [vmem:[%s2658_s8 + $0xa8] sm:$0xff] }
 0x556   : > { %v1819_v50 = vmul.f32 -1.442695, %v1134_v19 }
 0x557   : > { %2181 = vpow2.f32 %v1817_v31 }
 0x55f   : > { %v2180_v32 = vpop.eup %2179 }
 0x560   : > { %v1127_v34 = vadd.f32 1.0, %v2180_v32 }
 0x561   : > { %v2182_v35 = vpop.eup %2181 }
 0x562   : > { %2183 = vrcp.f32 %v1127_v34  ;;  %v1128_v36 = vadd.f32 1.0, %v2182_v35 }
 0x564   : > { %2185 = vrcp.f32 %v1128_v36 }
 0x565   : > { %2187 = vpow2.f32 %v1818_v20 }
 0x566   : > { %2189 = vpow2.f32 %v1819_v50  ;;  %v1835_v50 = vld [vmem:[%s2658_s8 + $0xb0] sm:$0xff] }
 0x56c   : > { %v2184_v37 = vpop.eup %2183 }
 0x56d   : > { %v1147_v39 = vmul.f32 %v2184_v37, %v2843_v22 }
 0x56e   : > { %v2186_v38 = vpop.eup %2185 }
 0x56f   : > { %v1148_v40 = vmul.f32 %v2186_v38, %v2847_v25  ;;  %v2188_v52 = vpop.eup %2187 }
 0x570   : > { %v2190_v56 = vpop.eup %2189  ;;  %v1141_v58 = vadd.f32 1.0, %v2188_v52 }
 0x571   : > { %v1149_v41 = vpack.c.bf16 %v1148_v40, %v1147_v39  ;;  %v1142_v63 = vadd.f32 1.0, %v2190_v56  ;;  %v1836_v56 = vld [vmem:[%s2658_s8 + $0xb8] sm:$0xff] }
 0x573   : > { %1969 = vmatmul.mubr.bf16.vlgmr.msra.gmra.mrb[8].mxu1 %v1149_v41 }
 0x574   : > { %1988 = vmatprep.mubr.msk.bf16.mxu1 %vm2421_vm0, %v2420_v23  ;;  %1973 = vmatpush3.bf16.msra.mxu1 %v2131_v10 }
 0x575   : > { %1974 = vmatprep.subr.bf16.mxu1 %v2420_v23 }
 0x646   : > { %v1248_v2 = vpop.f32.mrb[8].mxu1 }
 0x647   : > { %v1255_v54 = vadd.f32 %v1796_v51, %v1248_v2  ;;  %v1970_v55 = vpop.f32.mrb[9].mxu1 }
 0x648   : > { %v1251_v59 = vpop.f32.mrb[10].mxu1 }
 0x649   : > { %v1264_v60 = vadd.f32 %v2782_v26, %v1255_v54  ;;  %v1256_v61 = vadd.f32 %v1799_v53, %v1251_v59  ;;  %v1971_v62 = vpop.f32.mrb[11].mxu1  ;;  %v1833_v53 = vld [vmem:[%s2658_s8 + $0xa0] sm:$0xff]  ;;  %s1611_s8 = sshll.u32 %s2673_s26, 4  ;;  %s2937_s8 = int_to_ptr.vmem [resolvable:$true] %s1611_s8 }
 0x64a   : > { %s2333_s18 = scalar_lea.vmem %s2937_s8, 1024  ;;  %p2340_p2 = scmp.lt.s32.totalorder %s2937_s8, %s2338_s12 }
 0x64b   : > { %2191 = vtanh.f32 %v1264_v60  ;;  %v1265_v0 = vadd.f32 %v2782_v26, %v1256_v61  ;;  %p2334_p11 = scmp.ne.s32.totalorder %s2937_s8, %s2333_s18  ;;  %p2341_p1 = scmp.lt.s32.totalorder %s2339_s10, %s2333_s18 }
 0x64c   : > { %2193 = vrcp.f32 %v1141_v58 }
 0x64d   : > { %2195 = vtanh.f32 %v1265_v0  ;;  %p2335_p7 = pnand %p2334_p11, %p2606_p5  ;;  %p2342_p4 = por %p2341_p1, %p2340_p2 }
 0x64e   : > { %2197 = vrcp.f32 %v1142_v63 }
 0x64f   : > { %p2336_p13 = pneg %p2335_p7 }
 0x651   : > { %p2343_p10 = pnand %p2342_p4, %p2336_p13 }
 0x655   : > { %v2192_v1 = vpop.eup %2191 }
 0x656   : > { %v2194_v21 = vpop.eup %2193  ;;  %v1268_v24 = vsub.f32 %v2843_v22, %v2192_v1  ;;  %v2132_v22 = vld [vmem:[#allocation9 + $0x8] sm:$0xff]  }
 0x657   : > { %v2196_v27 = vpop.eup %2195  ;;  %1975 = vmatpush3.bf16.msra.mxu1 %v2132_v22 }
 0x658   : > { %v1270_v3 = vmul.f32 %v2194_v21, %v1268_v24  ;;  %v1269_v4 = vsub.f32 %v2847_v25, %v2196_v27  ;;  %v2198_v5 = vpop.eup %2197  ;;  %1976 = vmatprep.subr.bf16.mxu1 %v2420_v23  ;;  %v2133_v25 = vld [vmem:[#allocation9 + $0x10] sm:$0xff]  }
 0x65a   : > { %v2896_v6 = vadd.f32 %v2192_v1, %v1270_v3  ;;  %v1271_v7 = vmul.f32 %v2198_v5, %v1269_v4 }
 0x65b   : > { %1977 = vmatpush3.bf16.msra.mxu1 %v2133_v25 }
 0x65c   : > { %1829 = vst [vmem:[%s2673_s26 + $0x20] sm:$0xff] %v2896_v6  ;;  %v2900_v8 = vadd.f32 %v2196_v27, %v1271_v7  ;;  %1978 = vmatprep.subr.bf16.mxu1 %v2420_v23 }
 0x65e   : > { %1830 = vst [vmem:[%s2673_s26 + $0x28] sm:$0xff] %v2900_v8  ;;  %v1284_v9 = vpack.c.bf16 %v2900_v8, %v2896_v6 }
 0x65f   : > { %1979 = vmatpush3.bf16.msra.mxu1 %v2134_v11 }
 0x660   : > { %1426 = vmatmul.mubr.bf16.vlgmr.msra.gmra.mrb[12].mxu0 %v1284_v9  ;;  %1980 = vmatprep.subr.bf16.mxu1 %v2420_v23 }
 0x663   : > { %1981 = vmatpush3.bf16.msra.mxu1 %v2135_v12 }
 0x664   : > { %1982 = vmatprep.subr.bf16.mxu1 %v2420_v23 }
 0x667   : > { %1983 = vmatpush3.bf16.msra.mxu1 %v2136_v13 }
 0x668   : > { %1984 = vmatprep.subr.bf16.mxu1 %v2420_v23 }
 0x66b   : > { %1985 = vmatpush3.bf16.msra.mxu1 %v2137_v14 }
 0x66c   : > { %1986 = vmatprep.subr.bf16.mxu1 %v2420_v23 }
 0x66f   : > { %1987 = vmatpush3.bf16.msra.mxu1 %v2138_v15 }
 0x733   : > { %v1427_v46 = vpop.f32.mrb[12].mxu0 }
 0x734   : > { %v1428_v48 = vadd.f32 %v1427_v46, %v1306_v17  ;;  %v1429_v28 = vpop.f32.mrb[13].mxu0 }
 0x735   : > { %v1431_v30 = vpop.f32.mrb[14].mxu0  ;;  %v1430_v47 = vadd.f32 %v1429_v28, %v1310_v45 }
 0x736   : > { %v1436_v31 = vadd.f32 %v1831_v18, %v1428_v48  ;;  %v1432_v32 = vadd.f32 %v1431_v30, %v1306_v17  ;;  %v1433_v34 = vpop.f32.mrb[15].mxu0 }
 0x737   : > { %v1434_v19 = vadd.f32 %v1433_v34, %v1310_v45  ;;  %v1450_v20 = vadd.f32 %v1832_v49, %v1430_v47 }
 0x738   : > { %v1853_v35 = vmul.f32 -1.442695, %v1436_v31  ;;  %v1437_v36 = vadd.f32 %v1834_v29, %v1432_v32 }
 0x739   : > { %v1451_v51 = vadd.f32 %v1835_v50, %v1434_v19  ;;  %v1855_v52 = vmul.f32 -1.442695, %v1450_v20 }
 0x73a   : > { %2199 = vpow2.f32 %v1853_v35  ;;  %v1854_v23 = vmul.f32 -1.442695, %v1437_v36 }
 0x73b   : > { %v1856_v2 = vmul.f32 -1.442695, %v1451_v51 }
 0x73c   : > { %2201 = vpow2.f32 %v1854_v23 }
 0x744   : > { %v2200_v37 = vpop.eup %2199 }
 0x745   : > { %v1444_v38 = vadd.f32 1.0, %v2200_v37 }
 0x746   : > { %v2202_v39 = vpop.eup %2201 }
 0x747   : > { %2203 = vrcp.f32 %v1444_v38  ;;  %v1445_v33 = vadd.f32 1.0, %v2202_v39 }
 0x749   : > { %2205 = vrcp.f32 %v1445_v33 }
 0x74a   : > { %2207 = vpow2.f32 %v1855_v52 }
 0x74b   : > { %2209 = vpow2.f32 %v1856_v2 }
 0x751   : > { %v2204_v40 = vpop.eup %2203 }
 0x752   : > { %v1464_v42 = vmul.f32 %v2204_v40, %v2896_v6 }
 0x753   : > { %v2206_v41 = vpop.eup %2205 }
 0x754   : > { %v1465_v43 = vmul.f32 %v2206_v41, %v2900_v8  ;;  %v2208_v54 = vpop.eup %2207 }
 0x755   : > { %v2210_v60 = vpop.eup %2209  ;;  %v1458_v61 = vadd.f32 1.0, %v2208_v54 }
 0x756   : > { %v1466_v44 = vpack.c.bf16 %v1465_v43, %v1464_v42  ;;  %v1459_v1 = vadd.f32 1.0, %v2210_v60 }
 0x758   : > { %1989 = vmatmul.mubr.bf16.vlgmr.msra.gmra.mrb[12].mxu1 %v1466_v44 }
 0x82b   : > { %v1565_v55 = vpop.f32.mrb[12].mxu1 }
 0x82c   : > { %v1572_v58 = vadd.f32 %v1833_v53, %v1565_v55  ;;  %v1990_v59 = vpop.f32.mrb[13].mxu1 }
 0x82d   : > { %v1568_v62 = vpop.f32.mrb[14].mxu1 }
 0x82e   : > { %v1581_v57 = vadd.f32 %v2782_v26, %v1572_v58  ;;  %v1573_v63 = vadd.f32 %v1836_v56, %v1568_v62  ;;  %v1991_v0 = vpop.f32.mrb[15].mxu1 }
 0x830   : > { %2211 = vtanh.f32 %v1581_v57  ;;  %v1582_v21 = vadd.f32 %v2782_v26, %v1573_v63 }
 0x831   : > { %2213 = vrcp.f32 %v1458_v61 }
 0x832   : > { %2215 = vtanh.f32 %v1582_v21 }
 0x833   : > { %2217 = vrcp.f32 %v1459_v1 }
 0x83a   : > { %v2212_v24 = vpop.eup %2211 }
 0x83b   : > { %v2214_v27 = vpop.eup %2213  ;;  %v1585_v3 = vsub.f32 %v2896_v6, %v2212_v24 }
 0x83c   : > { %v2216_v4 = vpop.eup %2215 }
 0x83d   : > { %v1587_v5 = vmul.f32 %v2214_v27, %v1585_v3  ;;  %v1586_v7 = vsub.f32 %v2900_v8, %v2216_v4  ;;  %v2218_v9 = vpop.eup %2217 }
 0x83f   : > { %v1589_v10 = vadd.f32 %v2212_v24, %v1587_v5  ;;  %v1588_v26 = vmul.f32 %v2218_v9, %v1586_v7 }
 0x841   : > { %1866 = vst [vmem:[%s2673_s26 + $0x30] sm:$0xff] %v1589_v10  ;;  %1594 = vst [vmem:[#allocation2] sm:$0xff] %v1589_v10  ;;  %v1590_v6 = vadd.f32 %v2216_v4, %v1588_v26 }
 0x843   : > { %1867 = vst [vmem:[%s2673_s26 + $0x38] sm:$0xff] %v1590_v6  ;;  %1595 = vst [vmem:[#allocation2 + $0x8] sm:$0xff] %v1590_v6 }
 0x844   : > { %2346 = shalt.err (!%p2343_p10)
}
 0x845   : > { %s2347_s26 = scalar_lea.hbm %s2935_s7, 1024  ;;  %s2351_s14 = scalar_lea.hbm %s2989_s6, 2048 }
 0x846   : > { %p2348_p3 = scmp.ne.s32.totalorder %s2935_s7, %s2347_s26  ;;  %p2352_p0 = scmp.lt.u32.totalorder %s2935_s7, %s2989_s6 }
 0x847   : > { %p2353_p6 = scmp.lt.u32.totalorder %s2351_s14, %s2347_s26  ;;  %p2355_p11 = scmp.lt.u32.totalorder %s2347_s26, %s2935_s7 }
 0x848   : > { %p2349_p12 = pnand %p2348_p3, %p2606_p5 }
 0x849   : > { %p2354_p8 = por %p2353_p6, %p2352_p0 }
 0x84a   : > { %p2350_p9 = pneg %p2349_p12 }
 0x84b   : > { %p2356_p7 = por %p2355_p11, %p2354_p8 }
 0x84d   : > { %p2357_p13 = pnand %p2356_p7, %p2350_p9 }
 0x84f   : > { %2360 = shalt.err (!%p2357_p13)
}
 0x850   : > { %s2423_s29 = smov 128   ;;  %s2424_s27 = smov 8  }
 0x851   : > { %2009 = dma.vmem_to_hbm [thread:$0]  (%p2606_p5), %s2937_s8, 1024, %s2935_s7, %s1597_s25, %s2423_s29, %s2423_s29, %s2424_s27  }
 0x852 PF: > { %s1626_s18 = sand.u32 1, %s2395_s21   ;;  %p3008_p2 = scmp.ne.s32.totalorder %s2994_s28, 0 }
 0x853   : > { %p3009_p1 = scmp.ge.s32.totalorder %s2407_s24, 2  ;;  %s1627_s30 = scalar_lea.sflag [#allocation5], %s1626_s18 }
 0x855   : > { %p2026_p4 = pnand %p3009_p1, %p3008_p2 }
 0x857   : > { %2390 = dma.done.wait (!%p2026_p4), %s1627_s30, 1024  }
 0x858   : > { %2392 = vsyncadd (!%p2026_p4), %s1627_s30, 4294966272  ;;  %p21_p10 = scmp.ge.s32.totalorder %s2592_s11, 4   ;;  %s3010_s21 = smov %s2399_s22 }
 0x859   : > { %s3011_s22 = smov %s2403_s23  ;;  %s3012_s23 = smov %s2602_s15 }
 0x85a   : > { %s3013_s24 = smov %s2592_s11  ;;  %23 = sbr.rel (!%p21_p10) target bundleno = 7 (0x7), region = 111 }
 0x861   :  { %1632 = vsyncpa [#allocation4], 1 }
 0x862   :  { %1634 = vsyncpa [#allocation4 + $0x1], 1 }
 0x863   :  { %1635 = vsyncpa [#allocation7], 1 }
 0x864   :  { %1636 = vsyncpa [#allocation10], 1 }
 0x865   :  { %1637 = vsyncpa [#allocation5], 1 }
 0x866   :  { %1639 = vsyncpa [#allocation5 + $0x1], 1 }

</bundles_post_ra>
